<compile_context>
chip_gen: v6e
topology: v6e:2x2x1
jax: 0.10.0
libtpu: 0.0.40
codegen_flags: <defaults>
</compile_context>

<pallas_src>
import math

import jax
import jax.numpy as jnp
import numpy as np
from jax import lax
from jax.experimental import pallas as pl
from jax.experimental.pallas import tpu as pltpu


def _make_kernel(n_heads: int, d_head: int):
    scale = 1.0 / math.sqrt(d_head)

    def kernel(x_ref, tf_ref, mask_ref, wq_ref, wk_ref, wv_ref, wo_ref,
               bo_ref, null_ref, o_ref, obuf_ref):
        TL = x_ref.shape[1]
        N, Lt = tf_ref.shape[1], tf_ref.shape[2]

        x = x_ref[0]                       # (TL, D)
        m = mask_ref[0]                    # (TL, N) already binarized in wrapper
        wq = wq_ref[...]
        wk = wk_ref[...]
        wv = wv_ref[...]
        wo = wo_ref[...]                   # (I, D)

        # q projection hoisted out of the per-object loop (computed once / tile).
        # NOTE: dots run in the input dtype (bf16 inputs -> bf16 MXU) with f32
        # accumulation; here inputs are f32 to match the f32 reference exactly.
        q = jnp.dot(x, wq, preferred_element_type=jnp.float32)           # (TL, I)

        # One batched K/V projection over all objects' text tokens.
        tf_all = tf_ref[0].reshape(N * Lt, tf_ref.shape[3])              # (N*Lt, Dc)
        k_all = jnp.dot(tf_all, wk, preferred_element_type=jnp.float32)  # (N*Lt, I)
        v_all = jnp.dot(tf_all, wv, preferred_element_type=jnp.float32)  # (N*Lt, I)

        acc = jnp.zeros((TL, wo.shape[1]), jnp.float32)                  # (TL, D)
        for n in range(N):                                               # static unroll
            k = k_all[n * Lt:(n + 1) * Lt, :]                            # (Lt, I)
            v = v_all[n * Lt:(n + 1) * Lt, :]                            # (Lt, I)
            for h in range(n_heads):                                     # static unroll
                sl = slice(h * d_head, (h + 1) * d_head)
                qh, kh, vh = q[:, sl], k[:, sl], v[:, sl]
                # contraction on the last dims of both operands -> no transpose
                s = lax.dot_general(
                    qh, kh, (((1,), (1,)), ((), ())),
                    preferred_element_type=jnp.float32) * scale          # (TL, Lt)
                # TODO(synk): at SD scale (Lt=77, many heads) pack heads' scores
                # along lanes for a lane-dense segmented softmax.
                s = s - jnp.max(s, axis=-1, keepdims=True)
                p = jnp.exp(s)
                inv = pl.reciprocal(jnp.sum(p, axis=-1, keepdims=True),
                                    approx=True)
                p = p * inv
                obuf_ref[:, sl] = jnp.dot(p, vh,
                                          preferred_element_type=jnp.float32)
            # single full-K output projection per object
            x_obj = jnp.dot(obuf_ref[...], wo,
                            preferred_element_type=jnp.float32)          # (TL, D)
            acc = acc + x_obj * m[:, n:n + 1]

        msum = jnp.sum(m, axis=-1, keepdims=True)                        # (TL, 1)
        # hoisted bias add: sum_n m*(y+bo) == sum_n m*y + msum*bo
        out = acc + msum * bo_ref[...] + (1.0 - msum) * null_ref[...] + x
        o_ref[0] = out.astype(o_ref.dtype)

    return kernel


def _pick_l_tile(L: int) -> int:
    if L <= 1024:
        return L
    for cand in (1024, 512, 256, 128, 64, 32, 16, 8):
        if L % cand == 0:
            return cand
    return L  # fallback: single tile


def regional_cross_attention(x, reorg_masks, text_feat, params,
                             n_heads: int, d_head: int):
    """Pallas implementation of RegionalCrossAttention.forward (square L path).

    TODO(synk): optional objs['cross_attention_mask'] path and explicit H/W
    kwargs path are not implemented.
    """
    B, L, D = x.shape
    H = W = int(round(math.sqrt(L)))
    assert H * W == L, f"Input is not square, L={L}"
    N, Lt, Dc = text_feat.shape[1], text_feat.shape[2], text_feat.shape[3]
    I = n_heads * d_head

    # F.interpolate(mode='nearest') to (H, W): src = floor(dst * in / out),
    # plus the >0.5 binarization hoisted out of the kernel.
    Hin, Win = reorg_masks.shape[2], reorg_masks.shape[3]
    ri = (jnp.arange(H) * Hin) // H
    ci = (jnp.arange(W) * Win) // W
    m = reorg_masks[:, :, ri[:, None], ci[None, :]].astype(jnp.float32)
    m = jnp.where(m > 0.5, 1.0, 0.0)
    m = m.reshape(B, N, L).transpose(0, 2, 1)          # (B, L, N) lane-friendly

    TL = _pick_l_tile(L)
    n_l_tiles = L // TL

    kernel = _make_kernel(n_heads, d_head)

    # VMEM budget: double-buffered blocks + weights + (TL, I) scratch.
    itemsize = 4
    est = (2 * (2 * TL * D + N * Lt * Dc + TL * N)
           + 2 * (D * I + 2 * Dc * I + I * D + 2 * D)
           + TL * I) * itemsize
    vmem_limit = min(max(2 * est, 32 * 1024 * 1024), 64 * 1024 * 1024)

    out = pl.pallas_call(
        kernel,
        out_shape=jax.ShapeDtypeStruct((B, L, D), x.dtype),
        grid_spec=pltpu.PrefetchScalarGridSpec(
            num_scalar_prefetch=0,
            grid=(B, n_l_tiles),
            in_specs=[
                pl.BlockSpec((1, TL, D), lambda b, t: (b, t, 0)),          # x
                pl.BlockSpec((1, N, Lt, Dc), lambda b, t: (b, 0, 0, 0)),   # text_feat
                pl.BlockSpec((1, TL, N), lambda b, t: (b, t, 0)),          # masks
                pl.BlockSpec((D, I), lambda b, t: (0, 0)),                 # Wq
                pl.BlockSpec((Dc, I), lambda b, t: (0, 0)),                # Wk
                pl.BlockSpec((Dc, I), lambda b, t: (0, 0)),                # Wv
                pl.BlockSpec((I, D), lambda b, t: (0, 0)),                 # Wo (zeroed)
                pl.BlockSpec((1, D), lambda b, t: (0, 0)),                 # bo (zeroed)
                pl.BlockSpec((1, D), lambda b, t: (0, 0)),                 # null_text_feat
            ],
            out_specs=pl.BlockSpec((1, TL, D), lambda b, t: (b, t, 0)),
            scratch_shapes=[pltpu.VMEM((TL, I), jnp.float32)],             # per-head out buf
        ),
        compiler_params=pltpu.CompilerParams(
            dimension_semantics=("parallel", "parallel"),
            vmem_limit_bytes=vmem_limit),
    )(x, text_feat.astype(x.dtype), m,
      params["wq"], params["wk"], params["wv"],
      params["wo"], params["bo"], params["null"])
    return out


def init_params(key, query_dim, context_dim, n_heads, d_head):
    """Deterministic params matching RegionalCrossAttention.__init__ shapes.

    to_out[0] is passed through zero_module() and null_text_feat is zero-init,
    exactly as in the PyTorch module.
    """
    I = n_heads * d_head
    k1, k2, k3 = jax.random.split(key, 3)
    return {
        "wq": jax.random.normal(k1, (query_dim, I), jnp.float32) * 0.05,
        "wk": jax.random.normal(k2, (context_dim, I), jnp.float32) * 0.05,
        "wv": jax.random.normal(k3, (context_dim, I), jnp.float32) * 0.05,
        "wo": jnp.zeros((I, query_dim), jnp.float32),     # zero_module(to_out[0]).weight
        "bo": jnp.zeros((1, query_dim), jnp.float32),     # zero_module(to_out[0]).bias
        "null": jnp.zeros((1, query_dim), jnp.float32),   # null_text_feat
    }


def ref_forward(x, reorg_masks, text_feat, params, n_heads, d_head):
    """Pure-JAX reference of the same forward pass (for verification)."""
    B, L, D = x.shape
    H = W = int(round(math.sqrt(L)))
    N = text_feat.shape[1]
    Hin, Win = reorg_masks.shape[2], reorg_masks.shape[3]
    ri = (jnp.arange(H) * Hin) // H
    ci = (jnp.arange(W) * Win) // W
    m = reorg_masks[:, :, ri[:, None], ci[None, :]].astype(jnp.float32)
    m = jnp.where(m > 0.5, 1.0, 0.0).reshape(B, N, L, 1)

    scale = d_head ** -0.5
    q = jnp.einsum("bld,di->bli", x, params["wq"])
    k = jnp.einsum("bnld,di->bnli", text_feat, params["wk"])
    v = jnp.einsum("bnld,di->bnli", text_feat, params["wv"])
    qh = q.reshape(B, L, n_heads, d_head)
    kh = k.reshape(B, N, -1, n_heads, d_head)
    vh = v.reshape(B, N, -1, n_heads, d_head)
    s = jnp.einsum("bqhd,bnkhd->bnhqk", qh, kh) * scale
    p = jax.nn.softmax(s, axis=-1)
    o = jnp.einsum("bnhqk,bnkhd->bnqhd", p, vh).reshape(B, N, L, n_heads * d_head)
    x_obj = jnp.einsum("bnli,id->bnld", o, params["wo"]) + params["bo"][0]
    out = (x_obj * m).sum(axis=1) + (1.0 - m.sum(axis=1)) * params["null"][0] + x
    return out


if __name__ == "__main__":
    # Small shapes consistent with the module's forward.
    B, N = 2, 3                 # batch, num_objs
    H = W = 8
    L = H * W                   # 64 tokens (square latent)
    query_dim = 32
    context_dim = 32
    n_heads, d_head = 2, 16
    Lt = 8                      # text tokens per object
    Hm = Wm = 16                # native mask resolution

    key = jax.random.PRNGKey(0)
    kx, kt, km, kp, kw = jax.random.split(key, 5)

    x = jax.random.normal(kx, (B, L, query_dim), jnp.float32)
    text_feat = jax.random.normal(kt, (B, N, Lt, context_dim), jnp.float32)
    reorg_masks = (jax.random.uniform(km, (B, N, Hm, Wm)) > 0.5).astype(jnp.float32)

    # Faithful init (to_out zeroed, null_text_feat zero) -- as in __init__.
    params = init_params(kp, query_dim, context_dim, n_heads, d_head)

    out = regional_cross_attention(x, reorg_masks, text_feat, params,
                                   n_heads, d_head)
    out = jax.block_until_ready(out)

    # Sanity check vs pure-JAX reference (exact here since to_out is zeroed).
    ref = ref_forward(x, reorg_masks, text_feat, params, n_heads, d_head)
    np.testing.assert_allclose(np.asarray(out), np.asarray(ref),
                               rtol=1e-4, atol=1e-4)

    # Non-zero to_out / null_text_feat to exercise the full attention path.
    # Tolerance slightly loosened (2e-4) for the approx EUP reciprocal in the
    # softmax denominator.
    kw1, kw2, kw3 = jax.random.split(kw, 3)
    params_nz = dict(params)
    params_nz["wo"] = jax.random.normal(kw1, (n_heads * d_head, query_dim)) * 0.05
    params_nz["bo"] = jax.random.normal(kw2, (1, query_dim)) * 0.05
    params_nz["null"] = jax.random.normal(kw3, (1, query_dim)) * 0.05
    out_nz = jax.block_until_ready(
        regional_cross_attention(x, reorg_masks, text_feat, params_nz,
                                 n_heads, d_head))
    ref_nz = ref_forward(x, reorg_masks, text_feat, params_nz, n_heads, d_head)
    np.testing.assert_allclose(np.asarray(out_nz), np.asarray(ref_nz),
                               rtol=2e-4, atol=2e-4)

    print("KERNEL_OK")
</pallas_src>

<mosaic_0001>
module attributes {stable_mosaic.version = 11 : i64} {
  func.func @kernel(%arg0: i32, %arg1: i32, %arg2: memref<1x64x32xf32, #tpu.memory_space<vmem>>, %arg3: memref<1x3x8x32xf32, #tpu.memory_space<vmem>>, %arg4: memref<1x64x3xf32, #tpu.memory_space<vmem>>, %arg5: memref<32x32xf32, #tpu.memory_space<vmem>>, %arg6: memref<32x32xf32, #tpu.memory_space<vmem>>, %arg7: memref<32x32xf32, #tpu.memory_space<vmem>>, %arg8: memref<32x32xf32, #tpu.memory_space<vmem>>, %arg9: memref<1x32xf32, #tpu.memory_space<vmem>>, %arg10: memref<1x32xf32, #tpu.memory_space<vmem>>, %arg11: memref<1x64x32xf32, #tpu.memory_space<vmem>>, %arg12: memref<64x32xf32, #tpu.memory_space<vmem>>) attributes {dimension_semantics = [#tpu.dimension_semantics<parallel>, #tpu.dimension_semantics<parallel>], iteration_bounds = array<i64: 2, 1>, scalar_prefetch = 0 : i64, scratch_operands = 1 : i64, tpu.core_type = #tpu.core_type<tc>, window_params = [{transform_indices = @transform_0, window_bounds = array<i64: 1, 64, 32>}, {transform_indices = @transform_1, window_bounds = array<i64: 1, 3, 8, 32>}, {transform_indices = @transform_2, window_bounds = array<i64: 1, 64, 3>}, {pipeline_mode = #tpu.pipeline_mode<synchronous>, transform_indices = @transform_3, window_bounds = array<i64: 32, 32>}, {pipeline_mode = #tpu.pipeline_mode<synchronous>, transform_indices = @transform_4, window_bounds = array<i64: 32, 32>}, {pipeline_mode = #tpu.pipeline_mode<synchronous>, transform_indices = @transform_5, window_bounds = array<i64: 32, 32>}, {pipeline_mode = #tpu.pipeline_mode<synchronous>, transform_indices = @transform_6, window_bounds = array<i64: 32, 32>}, {pipeline_mode = #tpu.pipeline_mode<synchronous>, transform_indices = @transform_7, window_bounds = array<i64: 1, 32>}, {pipeline_mode = #tpu.pipeline_mode<synchronous>, transform_indices = @transform_8, window_bounds = array<i64: 1, 32>}, {transform_indices = @transform_9, window_bounds = array<i64: 1, 64, 32>}]} {
    %c0 = arith.constant 0 : index
    %c0_0 = arith.constant 0 : index
    %c0_1 = arith.constant 0 : index
    %0 = vector.load %arg2[%c0, %c0_0, %c0_1] : memref<1x64x32xf32, #tpu.memory_space<vmem>>, vector<1x64x32xf32>
    %1 = vector.shape_cast %0 : vector<1x64x32xf32> to vector<64x32xf32>
    %c0_2 = arith.constant 0 : index
    %c0_3 = arith.constant 0 : index
    %c0_4 = arith.constant 0 : index
    %2 = vector.load %arg4[%c0_2, %c0_3, %c0_4] : memref<1x64x3xf32, #tpu.memory_space<vmem>>, vector<1x64x3xf32>
    %3 = vector.shape_cast %2 : vector<1x64x3xf32> to vector<64x3xf32>
    %c0_5 = arith.constant 0 : index
    %c0_6 = arith.constant 0 : index
    %4 = vector.load %arg5[%c0_5, %c0_6] : memref<32x32xf32, #tpu.memory_space<vmem>>, vector<32x32xf32>
    %c0_7 = arith.constant 0 : index
    %c0_8 = arith.constant 0 : index
    %5 = vector.load %arg6[%c0_7, %c0_8] : memref<32x32xf32, #tpu.memory_space<vmem>>, vector<32x32xf32>
    %c0_9 = arith.constant 0 : index
    %c0_10 = arith.constant 0 : index
    %6 = vector.load %arg7[%c0_9, %c0_10] : memref<32x32xf32, #tpu.memory_space<vmem>>, vector<32x32xf32>
    %c0_11 = arith.constant 0 : index
    %c0_12 = arith.constant 0 : index
    %7 = vector.load %arg8[%c0_11, %c0_12] : memref<32x32xf32, #tpu.memory_space<vmem>>, vector<32x32xf32>
    %cst = arith.constant dense<0.000000e+00> : vector<64x32xf32>
    %8 = tpu.matmul %1, %4, %cst {dimension_numbers = #tpu.dot_dimension_numbers<[1], [0], [0], [1], [0, 0, 1, 1], [], []>} : vector<64x32xf32>, vector<32x32xf32>, vector<64x32xf32> -> vector<64x32xf32>
    %c0_13 = arith.constant 0 : index
    %c0_14 = arith.constant 0 : index
    %c0_15 = arith.constant 0 : index
    %c0_16 = arith.constant 0 : index
    %9 = vector.load %arg3[%c0_13, %c0_14, %c0_15, %c0_16] : memref<1x3x8x32xf32, #tpu.memory_space<vmem>>, vector<1x3x8x32xf32>
    %10 = vector.shape_cast %9 : vector<1x3x8x32xf32> to vector<3x8x32xf32>
    %11 = vector.shape_cast %10 : vector<3x8x32xf32> to vector<24x32xf32>
    %cst_17 = arith.constant dense<0.000000e+00> : vector<24x32xf32>
    %12 = tpu.matmul %11, %5, %cst_17 {dimension_numbers = #tpu.dot_dimension_numbers<[1], [0], [0], [1], [0, 0, 1, 1], [], []>} : vector<24x32xf32>, vector<32x32xf32>, vector<24x32xf32> -> vector<24x32xf32>
    %cst_18 = arith.constant dense<0.000000e+00> : vector<24x32xf32>
    %13 = tpu.matmul %11, %6, %cst_18 {dimension_numbers = #tpu.dot_dimension_numbers<[1], [0], [0], [1], [0, 0, 1, 1], [], []>} : vector<24x32xf32>, vector<32x32xf32>, vector<24x32xf32> -> vector<24x32xf32>
    %cst_19 = arith.constant 0.000000e+00 : f32
    %14 = vector.broadcast %cst_19 : f32 to vector<64x32xf32>
    %15 = vector.extract_strided_slice %12 {offsets = [0, 0], sizes = [8, 32], strides = [1, 1]} : vector<24x32xf32> to vector<8x32xf32>
    %16 = vector.extract_strided_slice %13 {offsets = [0, 0], sizes = [8, 32], strides = [1, 1]} : vector<24x32xf32> to vector<8x32xf32>
    %17 = vector.extract_strided_slice %8 {offsets = [0, 0], sizes = [64, 16], strides = [1, 1]} : vector<64x32xf32> to vector<64x16xf32>
    %18 = vector.extract_strided_slice %15 {offsets = [0, 0], sizes = [8, 16], strides = [1, 1]} : vector<8x32xf32> to vector<8x16xf32>
    %19 = vector.extract_strided_slice %16 {offsets = [0, 0], sizes = [8, 16], strides = [1, 1]} : vector<8x32xf32> to vector<8x16xf32>
    %cst_20 = arith.constant dense<0.000000e+00> : vector<64x8xf32>
    %20 = tpu.matmul %17, %18, %cst_20 {dimension_numbers = #tpu.dot_dimension_numbers<[1], [1], [0], [0], [0, 0, 1, 0], [], []>} : vector<64x16xf32>, vector<8x16xf32>, vector<64x8xf32> -> vector<64x8xf32>
    %cst_21 = arith.constant 2.500000e-01 : f32
    %21 = vector.broadcast %cst_21 : f32 to vector<64x8xf32>
    %22 = arith.mulf %20, %21 : vector<64x8xf32>
    %cst_22 = arith.constant dense<0xFF800000> : vector<64xf32>
    %23 = vector.multi_reduction <maximumf>, %22, %cst_22 [1] : vector<64x8xf32> to vector<64xf32>
    %24 = vector.shape_cast %23 : vector<64xf32> to vector<64x1xf32>
    %25 = vector.broadcast %24 : vector<64x1xf32> to vector<64x8xf32>
    %26 = arith.subf %22, %25 : vector<64x8xf32>
    %27 = math.exp %26 : vector<64x8xf32>
    %cst_23 = arith.constant dense<0.000000e+00> : vector<64xf32>
    %28 = vector.multi_reduction <add>, %27, %cst_23 [1] : vector<64x8xf32> to vector<64xf32>
    %29 = vector.shape_cast %28 : vector<64xf32> to vector<64x1xf32>
    %30 = tpu.reciprocal %29 {approx = true} : vector<64x1xf32> -> vector<64x1xf32>
    %31 = vector.broadcast %30 : vector<64x1xf32> to vector<64x8xf32>
    %32 = arith.mulf %27, %31 : vector<64x8xf32>
    %cst_24 = arith.constant dense<0.000000e+00> : vector<64x16xf32>
    %33 = tpu.matmul %32, %19, %cst_24 {dimension_numbers = #tpu.dot_dimension_numbers<[1], [0], [0], [1], [0, 0, 1, 1], [], []>} : vector<64x8xf32>, vector<8x16xf32>, vector<64x16xf32> -> vector<64x16xf32>
    %c0_25 = arith.constant 0 : index
    %c0_26 = arith.constant 0 : index
    %34 = vector.load %arg12[%c0_25, %c0_26] : memref<64x32xf32, #tpu.memory_space<vmem>>, vector<64x16xf32>
    tpu.vector_store %arg12[%c0_25, %c0_26], %33 {strides = array<i32>} : memref<64x32xf32, #tpu.memory_space<vmem>>, vector<64x16xf32>,
    %35 = vector.extract_strided_slice %8 {offsets = [0, 16], sizes = [64, 16], strides = [1, 1]} : vector<64x32xf32> to vector<64x16xf32>
    %36 = vector.extract_strided_slice %15 {offsets = [0, 16], sizes = [8, 16], strides = [1, 1]} : vector<8x32xf32> to vector<8x16xf32>
    %37 = vector.extract_strided_slice %16 {offsets = [0, 16], sizes = [8, 16], strides = [1, 1]} : vector<8x32xf32> to vector<8x16xf32>
    %cst_27 = arith.constant dense<0.000000e+00> : vector<64x8xf32>
    %38 = tpu.matmul %35, %36, %cst_27 {dimension_numbers = #tpu.dot_dimension_numbers<[1], [1], [0], [0], [0, 0, 1, 0], [], []>} : vector<64x16xf32>, vector<8x16xf32>, vector<64x8xf32> -> vector<64x8xf32>
    %cst_28 = arith.constant 2.500000e-01 : f32
    %39 = vector.broadcast %cst_28 : f32 to vector<64x8xf32>
    %40 = arith.mulf %38, %39 : vector<64x8xf32>
    %cst_29 = arith.constant dense<0xFF800000> : vector<64xf32>
    %41 = vector.multi_reduction <maximumf>, %40, %cst_29 [1] : vector<64x8xf32> to vector<64xf32>
    %42 = vector.shape_cast %41 : vector<64xf32> to vector<64x1xf32>
    %43 = vector.broadcast %42 : vector<64x1xf32> to vector<64x8xf32>
    %44 = arith.subf %40, %43 : vector<64x8xf32>
    %45 = math.exp %44 : vector<64x8xf32>
    %cst_30 = arith.constant dense<0.000000e+00> : vector<64xf32>
    %46 = vector.multi_reduction <add>, %45, %cst_30 [1] : vector<64x8xf32> to vector<64xf32>
    %47 = vector.shape_cast %46 : vector<64xf32> to vector<64x1xf32>
    %48 = tpu.reciprocal %47 {approx = true} : vector<64x1xf32> -> vector<64x1xf32>
    %49 = vector.broadcast %48 : vector<64x1xf32> to vector<64x8xf32>
    %50 = arith.mulf %45, %49 : vector<64x8xf32>
    %cst_31 = arith.constant dense<0.000000e+00> : vector<64x16xf32>
    %51 = tpu.matmul %50, %37, %cst_31 {dimension_numbers = #tpu.dot_dimension_numbers<[1], [0], [0], [1], [0, 0, 1, 1], [], []>} : vector<64x8xf32>, vector<8x16xf32>, vector<64x16xf32> -> vector<64x16xf32>
    %c0_32 = arith.constant 0 : index
    %c16 = arith.constant 16 : index
    %52 = vector.load %arg12[%c0_32, %c16] : memref<64x32xf32, #tpu.memory_space<vmem>>, vector<64x16xf32>
    tpu.vector_store %arg12[%c0_32, %c16], %51 {strides = array<i32>} : memref<64x32xf32, #tpu.memory_space<vmem>>, vector<64x16xf32>,
    %c0_33 = arith.constant 0 : index
    %c0_34 = arith.constant 0 : index
    %53 = vector.load %arg12[%c0_33, %c0_34] : memref<64x32xf32, #tpu.memory_space<vmem>>, vector<64x32xf32>
    %cst_35 = arith.constant dense<0.000000e+00> : vector<64x32xf32>
    %54 = tpu.matmul %53, %7, %cst_35 {dimension_numbers = #tpu.dot_dimension_numbers<[1], [0], [0], [1], [0, 0, 1, 1], [], []>} : vector<64x32xf32>, vector<32x32xf32>, vector<64x32xf32> -> vector<64x32xf32>
    %55 = vector.extract_strided_slice %3 {offsets = [0, 0], sizes = [64, 1], strides = [1, 1]} : vector<64x3xf32> to vector<64x1xf32>
    %56 = vector.broadcast %55 : vector<64x1xf32> to vector<64x32xf32>
    %57 = arith.mulf %54, %56 : vector<64x32xf32>
    %58 = arith.addf %14, %57 : vector<64x32xf32>
    %59 = vector.extract_strided_slice %12 {offsets = [8, 0], sizes = [8, 32], strides = [1, 1]} : vector<24x32xf32> to vector<8x32xf32>
    %60 = vector.extract_strided_slice %13 {offsets = [8, 0], sizes = [8, 32], strides = [1, 1]} : vector<24x32xf32> to vector<8x32xf32>
    %61 = vector.extract_strided_slice %8 {offsets = [0, 0], sizes = [64, 16], strides = [1, 1]} : vector<64x32xf32> to vector<64x16xf32>
    %62 = vector.extract_strided_slice %59 {offsets = [0, 0], sizes = [8, 16], strides = [1, 1]} : vector<8x32xf32> to vector<8x16xf32>
    %63 = vector.extract_strided_slice %60 {offsets = [0, 0], sizes = [8, 16], strides = [1, 1]} : vector<8x32xf32> to vector<8x16xf32>
    %cst_36 = arith.constant dense<0.000000e+00> : vector<64x8xf32>
    %64 = tpu.matmul %61, %62, %cst_36 {dimension_numbers = #tpu.dot_dimension_numbers<[1], [1], [0], [0], [0, 0, 1, 0], [], []>} : vector<64x16xf32>, vector<8x16xf32>, vector<64x8xf32> -> vector<64x8xf32>
    %cst_37 = arith.constant 2.500000e-01 : f32
    %65 = vector.broadcast %cst_37 : f32 to vector<64x8xf32>
    %66 = arith.mulf %64, %65 : vector<64x8xf32>
    %cst_38 = arith.constant dense<0xFF800000> : vector<64xf32>
    %67 = vector.multi_reduction <maximumf>, %66, %cst_38 [1] : vector<64x8xf32> to vector<64xf32>
    %68 = vector.shape_cast %67 : vector<64xf32> to vector<64x1xf32>
    %69 = vector.broadcast %68 : vector<64x1xf32> to vector<64x8xf32>
    %70 = arith.subf %66, %69 : vector<64x8xf32>
    %71 = math.exp %70 : vector<64x8xf32>
    %cst_39 = arith.constant dense<0.000000e+00> : vector<64xf32>
    %72 = vector.multi_reduction <add>, %71, %cst_39 [1] : vector<64x8xf32> to vector<64xf32>
    %73 = vector.shape_cast %72 : vector<64xf32> to vector<64x1xf32>
    %74 = tpu.reciprocal %73 {approx = true} : vector<64x1xf32> -> vector<64x1xf32>
    %75 = vector.broadcast %74 : vector<64x1xf32> to vector<64x8xf32>
    %76 = arith.mulf %71, %75 : vector<64x8xf32>
    %cst_40 = arith.constant dense<0.000000e+00> : vector<64x16xf32>
    %77 = tpu.matmul %76, %63, %cst_40 {dimension_numbers = #tpu.dot_dimension_numbers<[1], [0], [0], [1], [0, 0, 1, 1], [], []>} : vector<64x8xf32>, vector<8x16xf32>, vector<64x16xf32> -> vector<64x16xf32>
    %c0_41 = arith.constant 0 : index
    %c0_42 = arith.constant 0 : index
    %78 = vector.load %arg12[%c0_41, %c0_42] : memref<64x32xf32, #tpu.memory_space<vmem>>, vector<64x16xf32>
    tpu.vector_store %arg12[%c0_41, %c0_42], %77 {strides = array<i32>} : memref<64x32xf32, #tpu.memory_space<vmem>>, vector<64x16xf32>,
    %79 = vector.extract_strided_slice %8 {offsets = [0, 16], sizes = [64, 16], strides = [1, 1]} : vector<64x32xf32> to vector<64x16xf32>
    %80 = vector.extract_strided_slice %59 {offsets = [0, 16], sizes = [8, 16], strides = [1, 1]} : vector<8x32xf32> to vector<8x16xf32>
    %81 = vector.extract_strided_slice %60 {offsets = [0, 16], sizes = [8, 16], strides = [1, 1]} : vector<8x32xf32> to vector<8x16xf32>
    %cst_43 = arith.constant dense<0.000000e+00> : vector<64x8xf32>
    %82 = tpu.matmul %79, %80, %cst_43 {dimension_numbers = #tpu.dot_dimension_numbers<[1], [1], [0], [0], [0, 0, 1, 0], [], []>} : vector<64x16xf32>, vector<8x16xf32>, vector<64x8xf32> -> vector<64x8xf32>
    %cst_44 = arith.constant 2.500000e-01 : f32
    %83 = vector.broadcast %cst_44 : f32 to vector<64x8xf32>
    %84 = arith.mulf %82, %83 : vector<64x8xf32>
    %cst_45 = arith.constant dense<0xFF800000> : vector<64xf32>
    %85 = vector.multi_reduction <maximumf>, %84, %cst_45 [1] : vector<64x8xf32> to vector<64xf32>
    %86 = vector.shape_cast %85 : vector<64xf32> to vector<64x1xf32>
    %87 = vector.broadcast %86 : vector<64x1xf32> to vector<64x8xf32>
    %88 = arith.subf %84, %87 : vector<64x8xf32>
    %89 = math.exp %88 : vector<64x8xf32>
    %cst_46 = arith.constant dense<0.000000e+00> : vector<64xf32>
    %90 = vector.multi_reduction <add>, %89, %cst_46 [1] : vector<64x8xf32> to vector<64xf32>
    %91 = vector.shape_cast %90 : vector<64xf32> to vector<64x1xf32>
    %92 = tpu.reciprocal %91 {approx = true} : vector<64x1xf32> -> vector<64x1xf32>
    %93 = vector.broadcast %92 : vector<64x1xf32> to vector<64x8xf32>
    %94 = arith.mulf %89, %93 : vector<64x8xf32>
    %cst_47 = arith.constant dense<0.000000e+00> : vector<64x16xf32>
    %95 = tpu.matmul %94, %81, %cst_47 {dimension_numbers = #tpu.dot_dimension_numbers<[1], [0], [0], [1], [0, 0, 1, 1], [], []>} : vector<64x8xf32>, vector<8x16xf32>, vector<64x16xf32> -> vector<64x16xf32>
    %c0_48 = arith.constant 0 : index
    %c16_49 = arith.constant 16 : index
    %96 = vector.load %arg12[%c0_48, %c16_49] : memref<64x32xf32, #tpu.memory_space<vmem>>, vector<64x16xf32>
    tpu.vector_store %arg12[%c0_48, %c16_49], %95 {strides = array<i32>} : memref<64x32xf32, #tpu.memory_space<vmem>>, vector<64x16xf32>,
    %c0_50 = arith.constant 0 : index
    %c0_51 = arith.constant 0 : index
    %97 = vector.load %arg12[%c0_50, %c0_51] : memref<64x32xf32, #tpu.memory_space<vmem>>, vector<64x32xf32>
    %cst_52 = arith.constant dense<0.000000e+00> : vector<64x32xf32>
    %98 = tpu.matmul %97, %7, %cst_52 {dimension_numbers = #tpu.dot_dimension_numbers<[1], [0], [0], [1], [0, 0, 1, 1], [], []>} : vector<64x32xf32>, vector<32x32xf32>, vector<64x32xf32> -> vector<64x32xf32>
    %99 = vector.extract_strided_slice %3 {offsets = [0, 1], sizes = [64, 1], strides = [1, 1]} : vector<64x3xf32> to vector<64x1xf32>
    %100 = vector.broadcast %99 : vector<64x1xf32> to vector<64x32xf32>
    %101 = arith.mulf %98, %100 : vector<64x32xf32>
    %102 = arith.addf %58, %101 : vector<64x32xf32>
    %103 = vector.extract_strided_slice %12 {offsets = [16, 0], sizes = [8, 32], strides = [1, 1]} : vector<24x32xf32> to vector<8x32xf32>
    %104 = vector.extract_strided_slice %13 {offsets = [16, 0], sizes = [8, 32], strides = [1, 1]} : vector<24x32xf32> to vector<8x32xf32>
    %105 = vector.extract_strided_slice %8 {offsets = [0, 0], sizes = [64, 16], strides = [1, 1]} : vector<64x32xf32> to vector<64x16xf32>
    %106 = vector.extract_strided_slice %103 {offsets = [0, 0], sizes = [8, 16], strides = [1, 1]} : vector<8x32xf32> to vector<8x16xf32>
    %107 = vector.extract_strided_slice %104 {offsets = [0, 0], sizes = [8, 16], strides = [1, 1]} : vector<8x32xf32> to vector<8x16xf32>
    %cst_53 = arith.constant dense<0.000000e+00> : vector<64x8xf32>
    %108 = tpu.matmul %105, %106, %cst_53 {dimension_numbers = #tpu.dot_dimension_numbers<[1], [1], [0], [0], [0, 0, 1, 0], [], []>} : vector<64x16xf32>, vector<8x16xf32>, vector<64x8xf32> -> vector<64x8xf32>
    %cst_54 = arith.constant 2.500000e-01 : f32
    %109 = vector.broadcast %cst_54 : f32 to vector<64x8xf32>
    %110 = arith.mulf %108, %109 : vector<64x8xf32>
    %cst_55 = arith.constant dense<0xFF800000> : vector<64xf32>
    %111 = vector.multi_reduction <maximumf>, %110, %cst_55 [1] : vector<64x8xf32> to vector<64xf32>
    %112 = vector.shape_cast %111 : vector<64xf32> to vector<64x1xf32>
    %113 = vector.broadcast %112 : vector<64x1xf32> to vector<64x8xf32>
    %114 = arith.subf %110, %113 : vector<64x8xf32>
    %115 = math.exp %114 : vector<64x8xf32>
    %cst_56 = arith.constant dense<0.000000e+00> : vector<64xf32>
    %116 = vector.multi_reduction <add>, %115, %cst_56 [1] : vector<64x8xf32> to vector<64xf32>
    %117 = vector.shape_cast %116 : vector<64xf32> to vector<64x1xf32>
    %118 = tpu.reciprocal %117 {approx = true} : vector<64x1xf32> -> vector<64x1xf32>
    %119 = vector.broadcast %118 : vector<64x1xf32> to vector<64x8xf32>
    %120 = arith.mulf %115, %119 : vector<64x8xf32>
    %cst_57 = arith.constant dense<0.000000e+00> : vector<64x16xf32>
    %121 = tpu.matmul %120, %107, %cst_57 {dimension_numbers = #tpu.dot_dimension_numbers<[1], [0], [0], [1], [0, 0, 1, 1], [], []>} : vector<64x8xf32>, vector<8x16xf32>, vector<64x16xf32> -> vector<64x16xf32>
    %c0_58 = arith.constant 0 : index
    %c0_59 = arith.constant 0 : index
    %122 = vector.load %arg12[%c0_58, %c0_59] : memref<64x32xf32, #tpu.memory_space<vmem>>, vector<64x16xf32>
    tpu.vector_store %arg12[%c0_58, %c0_59], %121 {strides = array<i32>} : memref<64x32xf32, #tpu.memory_space<vmem>>, vector<64x16xf32>,
    %123 = vector.extract_strided_slice %8 {offsets = [0, 16], sizes = [64, 16], strides = [1, 1]} : vector<64x32xf32> to vector<64x16xf32>
    %124 = vector.extract_strided_slice %103 {offsets = [0, 16], sizes = [8, 16], strides = [1, 1]} : vector<8x32xf32> to vector<8x16xf32>
    %125 = vector.extract_strided_slice %104 {offsets = [0, 16], sizes = [8, 16], strides = [1, 1]} : vector<8x32xf32> to vector<8x16xf32>
    %cst_60 = arith.constant dense<0.000000e+00> : vector<64x8xf32>
    %126 = tpu.matmul %123, %124, %cst_60 {dimension_numbers = #tpu.dot_dimension_numbers<[1], [1], [0], [0], [0, 0, 1, 0], [], []>} : vector<64x16xf32>, vector<8x16xf32>, vector<64x8xf32> -> vector<64x8xf32>
    %cst_61 = arith.constant 2.500000e-01 : f32
    %127 = vector.broadcast %cst_61 : f32 to vector<64x8xf32>
    %128 = arith.mulf %126, %127 : vector<64x8xf32>
    %cst_62 = arith.constant dense<0xFF800000> : vector<64xf32>
    %129 = vector.multi_reduction <maximumf>, %128, %cst_62 [1] : vector<64x8xf32> to vector<64xf32>
    %130 = vector.shape_cast %129 : vector<64xf32> to vector<64x1xf32>
    %131 = vector.broadcast %130 : vector<64x1xf32> to vector<64x8xf32>
    %132 = arith.subf %128, %131 : vector<64x8xf32>
    %133 = math.exp %132 : vector<64x8xf32>
    %cst_63 = arith.constant dense<0.000000e+00> : vector<64xf32>
    %134 = vector.multi_reduction <add>, %133, %cst_63 [1] : vector<64x8xf32> to vector<64xf32>
    %135 = vector.shape_cast %134 : vector<64xf32> to vector<64x1xf32>
    %136 = tpu.reciprocal %135 {approx = true} : vector<64x1xf32> -> vector<64x1xf32>
    %137 = vector.broadcast %136 : vector<64x1xf32> to vector<64x8xf32>
    %138 = arith.mulf %133, %137 : vector<64x8xf32>
    %cst_64 = arith.constant dense<0.000000e+00> : vector<64x16xf32>
    %139 = tpu.matmul %138, %125, %cst_64 {dimension_numbers = #tpu.dot_dimension_numbers<[1], [0], [0], [1], [0, 0, 1, 1], [], []>} : vector<64x8xf32>, vector<8x16xf32>, vector<64x16xf32> -> vector<64x16xf32>
    %c0_65 = arith.constant 0 : index
    %c16_66 = arith.constant 16 : index
    %140 = vector.load %arg12[%c0_65, %c16_66] : memref<64x32xf32, #tpu.memory_space<vmem>>, vector<64x16xf32>
    tpu.vector_store %arg12[%c0_65, %c16_66], %139 {strides = array<i32>} : memref<64x32xf32, #tpu.memory_space<vmem>>, vector<64x16xf32>,
    %c0_67 = arith.constant 0 : index
    %c0_68 = arith.constant 0 : index
    %141 = vector.load %arg12[%c0_67, %c0_68] : memref<64x32xf32, #tpu.memory_space<vmem>>, vector<64x32xf32>
    %cst_69 = arith.constant dense<0.000000e+00> : vector<64x32xf32>
    %142 = tpu.matmul %141, %7, %cst_69 {dimension_numbers = #tpu.dot_dimension_numbers<[1], [0], [0], [1], [0, 0, 1, 1], [], []>} : vector<64x32xf32>, vector<32x32xf32>, vector<64x32xf32> -> vector<64x32xf32>
    %143 = vector.extract_strided_slice %3 {offsets = [0, 2], sizes = [64, 1], strides = [1, 1]} : vector<64x3xf32> to vector<64x1xf32>
    %144 = vector.broadcast %143 : vector<64x1xf32> to vector<64x32xf32>
    %145 = arith.mulf %142, %144 : vector<64x32xf32>
    %146 = arith.addf %102, %145 : vector<64x32xf32>
    %cst_70 = arith.constant dense<0.000000e+00> : vector<64xf32>
    %147 = vector.multi_reduction <add>, %3, %cst_70 [1] : vector<64x3xf32> to vector<64xf32>
    %148 = vector.shape_cast %147 : vector<64xf32> to vector<64x1xf32>
    %c0_71 = arith.constant 0 : index
    %c0_72 = arith.constant 0 : index
    %149 = vector.load %arg9[%c0_71, %c0_72] : memref<1x32xf32, #tpu.memory_space<vmem>>, vector<1x32xf32>
    %150 = vector.broadcast %148 : vector<64x1xf32> to vector<64x32xf32>
    %151 = vector.broadcast %149 : vector<1x32xf32> to vector<64x32xf32>
    %152 = arith.mulf %150, %151 : vector<64x32xf32>
    %153 = arith.addf %146, %152 : vector<64x32xf32>
    %cst_73 = arith.constant 1.000000e+00 : f32
    %154 = vector.broadcast %cst_73 : f32 to vector<64x1xf32>
    %155 = arith.subf %154, %148 : vector<64x1xf32>
    %c0_74 = arith.constant 0 : index
    %c0_75 = arith.constant 0 : index
    %156 = vector.load %arg10[%c0_74, %c0_75] : memref<1x32xf32, #tpu.memory_space<vmem>>, vector<1x32xf32>
    %157 = vector.broadcast %155 : vector<64x1xf32> to vector<64x32xf32>
    %158 = vector.broadcast %156 : vector<1x32xf32> to vector<64x32xf32>
    %159 = arith.mulf %157, %158 : vector<64x32xf32>
    %160 = arith.addf %153, %159 : vector<64x32xf32>
    %161 = arith.addf %160, %1 : vector<64x32xf32>
    %c0_76 = arith.constant 0 : index
    %c0_77 = arith.constant 0 : index
    %c0_78 = arith.constant 0 : index
    %162 = vector.load %arg11[%c0_76, %c0_77, %c0_78] : memref<1x64x32xf32, #tpu.memory_space<vmem>>, vector<1x64x32xf32>
    %163 = vector.shape_cast %162 : vector<1x64x32xf32> to vector<64x32xf32>
    %164 = vector.shape_cast %161 : vector<64x32xf32> to vector<1x64x32xf32>
    tpu.vector_store %arg11[%c0_76, %c0_77, %c0_78], %164 {strides = array<i32>} : memref<1x64x32xf32, #tpu.memory_space<vmem>>, vector<1x64x32xf32>,
    return
  }
  func.func @transform_0(%arg0: i32, %arg1: i32) -> (i32, i32, i32) {
    %c0_i32 = arith.constant 0 : i32
    %c0_i32_0 = arith.constant 0 : i32
    return %arg0, %arg1, %c0_i32 : i32, i32, i32
  }
  func.func @transform_1(%arg0: i32, %arg1: i32) -> (i32, i32, i32, i32) {
    %c0_i32 = arith.constant 0 : i32
    %c0_i32_0 = arith.constant 0 : i32
    %c0_i32_1 = arith.constant 0 : i32
    %c0_i32_2 = arith.constant 0 : i32
    return %arg0, %c0_i32, %c0_i32_0, %c0_i32_1 : i32, i32, i32, i32
  }
  func.func @transform_2(%arg0: i32, %arg1: i32) -> (i32, i32, i32) {
    %c0_i32 = arith.constant 0 : i32
    %c0_i32_0 = arith.constant 0 : i32
    return %arg0, %arg1, %c0_i32 : i32, i32, i32
  }
  func.func @transform_3(%arg0: i32, %arg1: i32) -> (i32, i32) {
    %c0_i32 = arith.constant 0 : i32
    %c0_i32_0 = arith.constant 0 : i32
    %c0_i32_1 = arith.constant 0 : i32
    return %c0_i32, %c0_i32_0 : i32, i32
  }
  func.func @transform_4(%arg0: i32, %arg1: i32) -> (i32, i32) {
    %c0_i32 = arith.constant 0 : i32
    %c0_i32_0 = arith.constant 0 : i32
    %c0_i32_1 = arith.constant 0 : i32
    return %c0_i32, %c0_i32_0 : i32, i32
  }
  func.func @transform_5(%arg0: i32, %arg1: i32) -> (i32, i32) {
    %c0_i32 = arith.constant 0 : i32
    %c0_i32_0 = arith.constant 0 : i32
    %c0_i32_1 = arith.constant 0 : i32
    return %c0_i32, %c0_i32_0 : i32, i32
  }
  func.func @transform_6(%arg0: i32, %arg1: i32) -> (i32, i32) {
    %c0_i32 = arith.constant 0 : i32
    %c0_i32_0 = arith.constant 0 : i32
    %c0_i32_1 = arith.constant 0 : i32
    return %c0_i32, %c0_i32_0 : i32, i32
  }
  func.func @transform_7(%arg0: i32, %arg1: i32) -> (i32, i32) {
    %c0_i32 = arith.constant 0 : i32
    %c0_i32_0 = arith.constant 0 : i32
    %c0_i32_1 = arith.constant 0 : i32
    return %c0_i32, %c0_i32_0 : i32, i32
  }
  func.func @transform_8(%arg0: i32, %arg1: i32) -> (i32, i32) {
    %c0_i32 = arith.constant 0 : i32
    %c0_i32_0 = arith.constant 0 : i32
    %c0_i32_1 = arith.constant 0 : i32
    return %c0_i32, %c0_i32_0 : i32, i32
  }
  func.func @transform_9(%arg0: i32, %arg1: i32) -> (i32, i32, i32) {
    %c0_i32 = arith.constant 0 : i32
    %c0_i32_0 = arith.constant 0 : i32
    return %arg0, %arg1, %c0_i32 : i32, i32, i32
  }
}

</mosaic_0001>

<bundles_post_ra>
// kernel: tpu_custom_call.1
= control target key start
LH: loop header
LB: loop body
LE: loop exit
PB: predicated region body
PF: predicated region fallthrough
CT: control target
= control target key end

     0   :  { %s4689_s30 = smov 0   ;;  %s4691_s10 = smov 0   ;;  %s5866_s0 = inlined_call_operand.vmem [shape: f32[2,64,32], index: 0, kind: input, shape index: {}]   ;;  %s5867_s1 = inlined_call_operand.vmem [shape: f32[2,3,8,32], index: 1, kind: input, shape index: {}]   ;;  %s5868_s2 = inlined_call_operand.vmem [shape: f32[2,64,3], index: 2, kind: input, shape index: {}]   ;;  %s5869_s3 = inlined_call_operand.vmem [shape: f32[32,32], index: 3, kind: input, shape index: {}]   ;;  %s5870_s4 = inlined_call_operand.vmem [shape: f32[32,32], index: 4, kind: input, shape index: {}]   ;;  %s5871_s5 = inlined_call_operand.vmem [shape: f32[32,32], index: 5, kind: input, shape index: {}]   ;;  %s5872_s6 = inlined_call_operand.vmem [shape: f32[32,32], index: 6, kind: input, shape index: {}]   ;;  %s5873_s7 = inlined_call_operand.vmem [shape: f32[1,32], index: 7, kind: input, shape index: {}]   ;;  %s5874_s8 = inlined_call_operand.vmem [shape: f32[1,32], index: 8, kind: input, shape index: {}]   ;;  %s5875_s9 = inlined_call_operand.vmem [shape: f32[2,64,32], index: 9, kind: output, shape index: {}]  }
   0x1   :  { %s4693_s11 = smov 0  }
   0x2 LB: > { %s31_s12 = sadd.s32 1, %s4626_s10  ;;  %p3757_p0 = scmp.ge.s32.totalorder %s4630_s11, 1  ;;  %s4630_s11 = sphi %s4693_s11, %s19_s11   ;;  %s4626_s10 = sphi %s4691_s10, %s5877_s10   ;;  %s4622_s30 = sphi %s4689_s30, %s5876_s30  }
   0x3   : > { %p33_p1 = scmp.ge.s32.totalorder %s31_s12, 2  ;;  %p335_p2 = scmp.lt.s32.totalorder %s4630_s11, 3 }
   0x5   : > { %s5879_s12 = smov (%p33_p1, %s31_s12), 0  ;;  %p336_p3 = pnand %p3757_p0, %p335_p2 }
   0x6   : > { %p394_p4 = scmp.lt.s32.totalorder (!%p336_p3), %s4622_s30, 1  ;;  %s4635_s20 = smov (!%p336_p3), 16  }
   0x7   : > { %339 = sbr.rel (%p336_p3) target bundleno = 2538 (0x9ea), region = 56 }
   0xc   : > { %v447_v0 = vld [vmem:[%s5869_s3 + $0x18] sm:$0xff]  ;;  %v446_v2 = vld [vmem:[%s5869_s3 + $0x10] sm:$0xff]  ;;  %v4632_v3 = vmov 0.0   ;;  %v445_v5 = vld [vmem:[%s5869_s3 + $0x8] sm:$0xff]  ;;  %s5881_s30 = smov (!%p394_p4, %s4622_s30), 1  ;;  %vm460_vm0 = vcmask 261120  }
   0xd   : > { %v451_v1 = vld [vmem:[%s5870_s4 + $0x18] sm:$0xff]  ;;  %4082 = vmatprep.subr.mxu0 %v447_v0  ;;  %4102 = vmatprep.subr.mxu1 %v4632_v3  ;;  %v450_v4 = vld [vmem:[%s5870_s4 + $0x10] sm:$0xff]  ;;  %v449_v6 = vld [vmem:[%s5870_s4 + $0x8] sm:$0xff]  ;;  %s4730_s27 = sshll.u32 %s5881_s30, 6  ;;  %s4366_s28 = smul.u32 24, %s5881_s30  ;;  %vm4633_vm1 = vmmov 0  }
   0xe   : > { %4083 = vmatpush3.msra.mxu0 %v447_v0  ;;  %4103 = vmatpush3.msra.mxu1 %v451_v1  ;;  %v444_v7 = vld [vmem:[%s5869_s3] sm:$0xff]  ;;  %s4737_s14 = scalar_lea.vmem %s5866_s0, %s4730_s27  ;;  %v455_v13 = vld [vmem:[%s5871_s5 + $0x18] sm:$0xff]  ;;  %v454_v17 = vld [vmem:[%s5871_s5 + $0x10] sm:$0xff]  ;;  %vm762_vm2 = vcmask 130048   ;;  %vm903_vm3 = vcmask 64512   ;;  %vm1531_vm4 = vcmask 261248   ;;  %s416_s16 = scalar_lea.vmem %s5868_s2, %s4730_s27 }
   0xf   : > { %4084 = vmatprep.subr.mxu0 %v446_v2  ;;  %4104 = vmatprep.subr.mxu1 %v4632_v3  ;;  %v428_v8 = vld [vmem:[%s4737_s14] sm:$0xff]  ;;  %s407_s18 = scalar_lea.vmem %s5867_s1, %s4366_s28  ;;  %v429_v10 = vld [vmem:[%s4737_s14 + $0x8] sm:$0xff]  ;;  %v430_v12 = vld [vmem:[%s4737_s14 + $0x10] sm:$0xff]  ;;  %s4634_s28 = smov 112   ;;  %vm3541_vm5 = vcmask 23552  }
  0x10   : > { %4085 = vmatpush3.msra.mxu0 %v446_v2  ;;  %4105 = vmatpush3.msra.mxu1 %v450_v4  ;;  %v448_v9 = vld [vmem:[%s5870_s4] sm:$0xff]  ;;  %v431_v14 = vld [vmem:[%s4737_s14 + $0x18] sm:$0xff]  ;;  %v591_v15 = vld [vmem:[%s407_s18 + $0x8] sm:$0xff]  ;;  %s5809_s22 = scalar_lea.vmem %s5875_s9, %s4730_s27 }
  0x11   : > { %4086 = vmatprep.subr.mxu0 %v445_v5  ;;  %4106 = vmatprep.subr.mxu1 %v4632_v3  ;;  %v590_v11 = vld [vmem:[%s407_s18] sm:$0xff]  ;;  %v433_v18 = vld [vmem:[%s4737_s14 + $0x28] sm:$0xff]  ;;  %v592_v19 = vld [vmem:[%s407_s18 + $0x10] sm:$0xff] }
  0x12   : > { %4087 = vmatpush3.msra.mxu0 %v445_v5  ;;  %4107 = vmatpush3.msra.mxu1 %v449_v6  ;;  %v432_v16 = vld [vmem:[%s4737_s14 + $0x20] sm:$0xff]  ;;  %v434_v20 = vld [vmem:[%s4737_s14 + $0x30] sm:$0xff]  ;;  %v453_v21 = vld [vmem:[%s5871_s5 + $0x8] sm:$0xff] }
  0x13   : > { %4088 = vmatprep.subr.mxu0 %v444_v7  ;;  %4108 = vmatprep.subr.mxu1 %v4632_v3  ;;  %v435_v22 = vld [vmem:[%s4737_s14 + $0x38] sm:$0xff]  ;;  %v452_v23 = vld [vmem:[%s5871_s5] sm:$0xff]  ;;  %v4878_v48 = vld [vmem:[%s5872_s6 + $0x10] sm:$0xff] }
  0x14   : > { %4089 = vmatpush3.msra.mxu0 %v444_v7  ;;  %4090 = vmatprep.mubr.msk.f32.mxu0 %vm460_vm0, %v428_v8  ;;  %v4864_v45 = vld [vmem:[%s5872_s6 + $0x18] sm:$0xff]  ;;  %v4890_v50 = vld [vmem:[%s5872_s6 + $0x8] sm:$0xff]  ;;  %v4899_v52 = vld [vmem:[%s5872_s6] sm:$0xff] }
  0x15   : > { %4109 = vmatpush3.msra.mxu1 %v448_v9  ;;  %4110 = vmatprep.mubr.msk.f32.mxu1 %vm4633_vm1, %v4632_v3 }
  0x16   : > { %4091 = vmatmul.mubr.msk.f32.vlgmr.msra.gmra.mxu0 %vm460_vm0, %v429_v10  ;;  %4111 = vmatmul.mubr.msk.f32.vlgmr.msra.gmra.mxu1 %vm460_vm0, %v590_v11 }
  0x17   : > { %4093 = vmatprep.mubr.msk.f32.mxu0 %vm460_vm0, %v430_v12  ;;  %4113 = vmatprep.mubr.msk.f32.mxu1 %vm4633_vm1, %v4632_v3 }
  0x18   : > { %4119 = vmatprep.subr.mxu1 %v4632_v3 }
  0x19   : > { %4120 = vmatpush3.msra.mxu1 %v455_v13 }
  0x1a   : > { %4094 = vmatmul.mubr.msk.f32.gmra.mxu0 %vm460_vm0, %v431_v14  ;;  %4114 = vmatmul.mubr.msk.f32.gmra.mxu1 %vm460_vm0, %v591_v15 }
  0x1b   : > { %4096 = vmatprep.mubr.msk.f32.mxu0 %vm460_vm0, %v432_v16  ;;  %4121 = vmatprep.subr.mxu1 %v4632_v3 }
  0x1c   : > { %4122 = vmatpush3.msra.mxu1 %v454_v17  ;;  %4116 = vmatprep.mubr.msk.f32.mxu1 %vm4633_vm1, %v4632_v3 }
  0x1d   : > { %4123 = vmatprep.subr.mxu1 %v4632_v3 }
  0x1e   : > { %4097 = vmatmul.mubr.msk.f32.gmra.mxu0 %vm460_vm0, %v433_v18  ;;  %4117 = vmatmul.mubr.msk.f32.gmra.mxu1 %vm460_vm0, %v592_v19 }
  0x1f   : > { %4099 = vmatprep.mubr.msk.f32.mxu0 %vm460_vm0, %v434_v20  ;;  %4124 = vmatpush3.msra.mxu1 %v453_v21 }
  0x20   : > { %4125 = vmatprep.subr.mxu1 %v4632_v3  ;;  %4127 = vmatprep.mubr.msk.f32.mxu1 %vm4633_vm1, %v4632_v3 }
  0x21   : > { %4126 = vmatpush3.msra.mxu1 %v452_v23 }
  0x22   : > { %4100 = vmatmul.mubr.msk.f32.gmra.mxu0 %vm460_vm0, %v435_v22  ;;  %4128 = vmatmul.mubr.msk.f32.vlgmr.msra.gmra.mxu1 %vm460_vm0, %v590_v11 }
  0x23   : > { %4130 = vmatprep.mubr.msk.f32.mxu1 %vm4633_vm1, %v4632_v3 }
  0x26   : > { %4131 = vmatmul.mubr.msk.f32.gmra.mxu1 %vm460_vm0, %v591_v15 }
  0x27   : > { %4133 = vmatprep.mubr.msk.f32.mxu1 %vm4633_vm1, %v4632_v3 }
  0x2a   : > { %4134 = vmatmul.mubr.msk.f32.gmra.mxu1 %vm460_vm0, %v592_v19 }
  0xd6   : > { %v4796_v24 = vpop.f32.mrf.mxu0  ;;  %v668_v25 = vpop.f32.mrf.mxu1 }
  0xd7   : > { %1145 = vrot.lane.b32.xlu0 %v668_v25, %s4634_s28  ;;  %4136 = vmatprep.subr.msk.mxu0 %vm762_vm2, %v668_v25 }
  0xd8   : > { %4364 = vmatprep.subr.msk.mxu1 %vm762_vm2, %v668_v25  ;;  %v4801_v26 = vpop.f32.mrf.mxu0  ;;  %v4112_v27 = vpop.f32.mrf.mxu1  ;;  %4137 = vmatpush3.xpose.msk.msra.mxu0 %vm762_vm2, %v668_v25 }
  0xd9   : > { %4365 = vmatpush3.xpose.msk.msra.mxu1 %vm762_vm2, %v668_v25  ;;  %1131 = vrot.lane.b32.xlu1 %v4796_v24, %s4634_s28 }
  0xda   : > { %4138 = vmatprep.mubr.msk.f32.mxu0 %vm762_vm2, %v4801_v26  ;;  %v4809_v28 = vpop.f32.mrf.mxu0  ;;  %v4815_v29 = vpop.f32.mrf.mxu1 }
  0xdb   : > { %1129 = vrot.lane.b32.xlu0 %v4801_v26, %s4634_s28  ;;  %4139 = vmatmul.mubr.msk.f32.vlgmr.msra.gmra.mxu0 %vm762_vm2, %v4796_v24 }
  0xdc   : > { %v4817_v30 = vpop.f32.mrf.mxu0  ;;  %v4115_v31 = vpop.f32.mrf.mxu1 }
  0xdd   : > { %1133 = vrot.lane.b32.xlu1 %v4817_v30, %s4634_s28  ;;  %4141 = vmatprep.mubr.msk.f32.mxu0 %vm762_vm2, %v4817_v30 }
  0xde   : > { %v4823_v32 = vpop.f32.mrf.mxu0  ;;  %v4829_v33 = vpop.f32.mrf.mxu1 }
  0xdf   : > { %1135 = vrot.lane.b32.xlu0 %v4809_v28, %s4634_s28  ;;  %4142 = vmatmul.mubr.msk.f32.gmra.mxu0 %vm762_vm2, %v4809_v28 }
  0xe0   : > { %v4831_v34 = vpop.f32.mrf.mxu0  ;;  %v4118_v35 = vpop.f32.mrf.mxu1 }
  0xe1   : > { %1137 = vrot.lane.b32.xlu1 %v4831_v34, %s4634_s28  ;;  %4144 = vmatprep.mubr.msk.f32.mxu0 %vm762_vm2, %v4831_v34 }
  0xe2   : > { %v4837_v36 = vpop.f32.mrf.mxu0  ;;  %v4853_v38 = vpop.f32.mrf.mxu1 }
  0xe3   : > { %1139 = vrot.lane.b32.xlu0 %v4823_v32, %s4634_s28  ;;  %4145 = vmatmul.mubr.msk.f32.gmra.mxu0 %vm762_vm2, %v4823_v32 }
  0xe4   : > { %v4843_v37 = vpop.f32.mrf.mxu0  ;;  %4150 = vmatprep.subr.mxu1 %v4853_v38  ;;  %v4129_v39 = vpop.f32.mrf.mxu1 }
  0xe5   : > { %1141 = vrot.lane.b32.xlu1 %v4843_v37, %s4634_s28  ;;  %4147 = vmatprep.mubr.msk.f32.mxu1 %vm762_vm2, %v4843_v37 }
  0xe6   : > { %4148 = vmatmul.mubr.msk.f32.vlgmr.msra.gmra.mxu1 %vm762_vm2, %v4837_v36  ;;  %v4857_v40 = vpop.f32.mrf.mxu1 }
  0xe7   : > { %1143 = vrot.lane.b32.xlu0 %v4837_v36, %s4634_s28  ;;  %4151 = vmatpush3.msra.mxu1 %v4853_v38 }
  0xe8   : > { %v4132_v41 = vpop.f32.mrf.mxu1 }
  0xea   : > { %v4859_v42 = vpop.f32.mrf.mxu1 }
  0xec   : > { %v4135_v43 = vpop.f32.mrf.mxu1 }
 0x149   : > { %v1146_v44 = vpop.permute.xlu0 %1145 }
 0x14a   : > { %4164 = vmatprep.subr.msk.mxu0 %vm762_vm2, %v1146_v44 }
 0x14b   : > { %v4867_v46 = vpop.permute.xlu1 %1131  ;;  %4165 = vmatpush3.xpose.msk.msra.mxu0 %vm762_vm2, %v1146_v44 }
 0x14c   : > { %4192 = vmatprep.subr.mxu0 %v4864_v45 }
 0x14d   : > { %v4871_v47 = vpop.permute.xlu0 %1129 }
 0x14e   : > { %4166 = vmatprep.mubr.msk.f32.mxu0 %vm762_vm2, %v4871_v47 }
 0x14f   : > { %v4880_v49 = vpop.permute.xlu1 %1133  ;;  %4167 = vmatmul.mubr.msk.f32.vlgmr.msra.gmra.mxu0 %vm762_vm2, %v4867_v46 }
 0x150   : > { %4169 = vmatprep.mubr.msk.f32.mxu0 %vm762_vm2, %v4880_v49  ;;  %4193 = vmatpush3.msra.mxu0 %v4864_v45 }
 0x151   : > { %v4892_v51 = vpop.permute.xlu0 %1135  ;;  %4194 = vmatprep.subr.mxu0 %v4878_v48 }
 0x152   : > { %4195 = vmatpush3.msra.mxu0 %v4878_v48 }
 0x153   : > { %v4901_v53 = vpop.permute.xlu1 %1137  ;;  %4170 = vmatmul.mubr.msk.f32.gmra.mxu0 %vm762_vm2, %v4892_v51  ;;  %4196 = vmatprep.subr.mxu0 %v4890_v50 }
 0x154   : > { %4172 = vmatprep.mubr.msk.f32.mxu0 %vm762_vm2, %v4901_v53  ;;  %4197 = vmatpush3.msra.mxu0 %v4890_v50 }
 0x155   : > { %v4909_v54 = vpop.permute.xlu0 %1139  ;;  %4198 = vmatprep.subr.mxu0 %v4899_v52 }
 0x156   : > { %4199 = vmatpush3.msra.mxu0 %v4899_v52 }
 0x157   : > { %4173 = vmatmul.mubr.msk.f32.gmra.mxu0 %vm762_vm2, %v4909_v54  ;;  %v4915_v55 = vpop.permute.xlu1 %1141  ;;  %4226 = vmatprep.subr.mxu0 %v4857_v40 }
 0x158   : > { %4175 = vmatprep.mubr.msk.f32.mxu0 %vm762_vm2, %v4915_v55 }
 0x159   : > { %v4920_v56 = vpop.permute.xlu0 %1143 }
 0x15b   : > { %4176 = vmatmul.mubr.msk.f32.gmra.mxu0 %vm762_vm2, %v4920_v56 }
 0x19b   : > { %v4140_v57 = vpop.f32.mrf.mxu0 }
 0x19c   : > { %v4924_v58 = vmul.f32 0.25, %v4140_v57 }
 0x19d   : > { %v856_v59 = vpop.f32.mrf.mxu0 }
 0x19e   : > { %v4926_v60 = vmul.f32 0.25, %v856_v59  ;;  %v907_v61 = vsel %vm903_vm3, %v4924_v58, -inf }
 0x19f   : > { %908 = vmax.xlane.f32.xlu0 %v907_v61  ;;  %v4143_v62 = vpop.f32.mrf.mxu0 }
 0x1a0   : > { %v4930_v63 = vmul.f32 0.25, %v4143_v62  ;;  %v904_v0 = vsel %vm903_vm3, %v4926_v60, -inf }
 0x1a1   : > { %905 = vmax.xlane.f32.xlu1 %v904_v0  ;;  %v866_v1 = vpop.f32.mrf.mxu0 }
 0x1a2   : > { %v4934_v2 = vmul.f32 0.25, %v866_v1  ;;  %v913_v5 = vsel %vm903_vm3, %v4930_v63, -inf }
 0x1a3   : > { %v4146_v3 = vpop.f32.mrf.mxu0 }
 0x1a4   : > { %v4936_v4 = vmul.f32 0.25, %v4146_v3  ;;  %v910_v6 = vsel %vm903_vm3, %v4934_v2, -inf }
 0x1a5   : > { %914 = vmax.xlane.f32.xlu1 %v913_v5  ;;  %911 = vmax.xlane.f32.xlu0 %v910_v6  ;;  %v876_v7 = vpop.f32.mrf.mxu0 }
 0x1a6   : > { %v4942_v8 = vmul.f32 0.25, %v876_v7  ;;  %v4149_v9 = vpop.f32.mrf.mxu1  ;;  %v919_v12 = vsel %vm903_vm3, %v4936_v4, -inf }
 0x1a7   : > { %v4944_v10 = vmul.f32 0.25, %v4149_v9 }
 0x1a8   : > { %v886_v11 = vpop.f32.mrf.mxu1  ;;  %v916_v13 = vsel %vm903_vm3, %v4942_v8, -inf }
 0x1a9   : > { %v4950_v14 = vmul.f32 0.25, %v886_v11  ;;  %920 = vmax.xlane.f32.xlu1 %v919_v12  ;;  %917 = vmax.xlane.f32.xlu0 %v916_v13  ;;  %v925_v16 = vsel %vm903_vm3, %v4944_v10, -inf }
 0x1ab   : > { %v922_v15 = vsel %vm903_vm3, %v4950_v14, -inf }
 0x1ad   : > { %926 = vmax.xlane.f32.xlu1 %v925_v16  ;;  %923 = vmax.xlane.f32.xlu0 %v922_v15 }
 0x20f   : > { %v4168_v17 = vpop.f32.mrf.mxu0 }
 0x210   : > { %v4956_v18 = vmul.f32 0.25, %v4168_v17 }
 0x211   : > { %v1231_v19 = vpop.f32.mrf.mxu0 }
 0x212   : > { %v4958_v20 = vmul.f32 0.25, %v1231_v19  ;;  %v1281_v21 = vsel %vm903_vm3, %v4956_v18, -inf }
 0x213   : > { %1282 = vmax.xlane.f32.xlu1 %v1281_v21  ;;  %v4171_v22 = vpop.f32.mrf.mxu0 }
 0x214   : > { %v4962_v23 = vmul.f32 0.25, %v4171_v22  ;;  %v1278_v25 = vsel %vm903_vm3, %v4958_v20, -inf }
 0x215   : > { %v1241_v27 = vpop.f32.mrf.mxu0  ;;  %1279 = vmax.xlane.f32.xlu0 %v1278_v25 }
 0x216   : > { %v4966_v31 = vmul.f32 0.25, %v1241_v27  ;;  %v1287_v35 = vsel %vm903_vm3, %v4962_v23, -inf }
 0x217   : > { %1288 = vmax.xlane.f32.xlu1 %v1287_v35  ;;  %v4174_v39 = vpop.f32.mrf.mxu0 }
 0x218   : > { %v4970_v41 = vmul.f32 0.25, %v4174_v39  ;;  %v1284_v43 = vsel %vm903_vm3, %v4966_v31, -inf }
 0x219   : > { %v1251_v44 = vpop.f32.mrf.mxu0  ;;  %1285 = vmax.xlane.f32.xlu0 %v1284_v43 }
 0x21a   : > { %v4974_v57 = vmul.f32 0.25, %v1251_v44  ;;  %v1293_v59 = vsel %vm903_vm3, %v4970_v41, -inf }
 0x21b   : > { %1294 = vmax.xlane.f32.xlu1 %v1293_v59  ;;  %v4177_v61 = vpop.f32.mrf.mxu0 }
 0x21c   : > { %v4978_v62 = vmul.f32 0.25, %v4177_v61  ;;  %v1290_v0 = vsel %vm903_vm3, %v4974_v57, -inf }
 0x21d   : > { %v1261_v1 = vpop.f32.mrf.mxu0  ;;  %1291 = vmax.xlane.f32.xlu0 %v1290_v0 }
 0x21e   : > { %v4982_v3 = vmul.f32 0.25, %v1261_v1  ;;  %v1299_v5 = vsel %vm903_vm3, %v4978_v62, -inf }
 0x21f   : > { %1300 = vmax.xlane.f32.xlu1 %v1299_v5 }
 0x220   : > { %v1296_v6 = vsel %vm903_vm3, %v4982_v3, -inf }
 0x221   : > { %1297 = vmax.xlane.f32.xlu0 %v1296_v6 }
 0x228   : > { %v909_v7 = vpop.xlane.xlu0 %908 }
 0x229   : > { %v929_v9 = vsub.f32 %v4924_v58, %v909_v7 }
 0x22a   : > { %v906_v11 = vpop.xlane.xlu1 %905 }
 0x22b   : > { %v938_v12 = vmul.f32 1.442695, %v929_v9  ;;  %v928_v13 = vsub.f32 %v4926_v60, %v906_v11 }
 0x22d   : > { %4404 = vpow2.f32 %v938_v12  ;;  %v936_v15 = vmul.f32 1.442695, %v928_v13 }
 0x22e   : > { %v915_v16 = vpop.xlane.xlu1 %914  ;;  %v912_v17 = vpop.xlane.xlu0 %911 }
 0x22f   : > { %4406 = vpow2.f32 %v936_v15  ;;  %v931_v19 = vsub.f32 %v4930_v63, %v915_v16  ;;  %v930_v21 = vsub.f32 %v4934_v2, %v912_v17 }
 0x231   : > { %v942_v22 = vmul.f32 1.442695, %v931_v19  ;;  %v940_v25 = vmul.f32 1.442695, %v930_v21 }
 0x232   : > { %v921_v27 = vpop.xlane.xlu1 %920  ;;  %v918_v35 = vpop.xlane.xlu0 %917 }
 0x233   : > { %4408 = vpow2.f32 %v942_v22  ;;  %v933_v58 = vsub.f32 %v4936_v4, %v921_v27  ;;  %v932_v39 = vsub.f32 %v4942_v8, %v918_v35 }
 0x234   : > { %4410 = vpow2.f32 %v940_v25 }
 0x235   : > { %v946_v60 = vmul.f32 1.442695, %v933_v58  ;;  %v944_v43 = vmul.f32 1.442695, %v932_v39 }
 0x236   : > { %v927_v44 = vpop.xlane.xlu1 %926  ;;  %v924_v59 = vpop.xlane.xlu0 %923 }
 0x237   : > { %4412 = vpow2.f32 %v946_v60  ;;  %v935_v61 = vsub.f32 %v4944_v10, %v927_v44  ;;  %v934_v63 = vsub.f32 %v4950_v14, %v924_v59 }
 0x238   : > { %4414 = vpow2.f32 %v944_v43 }
 0x239   : > { %v950_v2 = vmul.f32 1.442695, %v935_v61  ;;  %v948_v0 = vmul.f32 1.442695, %v934_v63 }
 0x23a   : > { %v4996_v1 = vpop.eup %4404 }
 0x23b   : > { %4416 = vpow2.f32 %v950_v2  ;;  %v955_v4 = vsel %vm903_vm3, %v4996_v1, 0.0 }
 0x23c   : > { %v5000_v8 = vpop.eup %4406  ;;  %4418 = vpow2.f32 %v948_v0  ;;  %956 = vadd.xlane.f32.xlu1 %v955_v4 }
 0x23d   : > { %v952_v5 = vsel %vm903_vm3, %v5000_v8, 0.0 }
 0x23e   : > { %953 = vadd.xlane.f32.xlu0 %v952_v5 }
 0x240   : > { %v5004_v10 = vpop.eup %4408 }
 0x241   : > { %v5006_v14 = vpop.eup %4410  ;;  %v961_v6 = vsel %vm903_vm3, %v5004_v10, 0.0 }
 0x242   : > { %962 = vadd.xlane.f32.xlu1 %v961_v6  ;;  %v958_v7 = vsel %vm903_vm3, %v5006_v14, 0.0 }
 0x243   : > { %959 = vadd.xlane.f32.xlu0 %v958_v7 }
 0x244   : > { %v5012_v9 = vpop.eup %4412 }
 0x245   : > { %v5014_v11 = vpop.eup %4414  ;;  %v967_v12 = vsel %vm903_vm3, %v5012_v9, 0.0 }
 0x246   : > { %968 = vadd.xlane.f32.xlu1 %v967_v12  ;;  %v964_v13 = vsel %vm903_vm3, %v5014_v11, 0.0 }
 0x247   : > { %965 = vadd.xlane.f32.xlu0 %v964_v13 }
 0x248   : > { %v5020_v15 = vpop.eup %4416 }
 0x249   : > { %v5022_v16 = vpop.eup %4418  ;;  %v973_v17 = vsel %vm903_vm3, %v5020_v15, 0.0 }
 0x24a   : > { %974 = vadd.xlane.f32.xlu1 %v973_v17  ;;  %v970_v19 = vsel %vm903_vm3, %v5022_v16, 0.0 }
 0x24b   : > { %971 = vadd.xlane.f32.xlu0 %v970_v19 }
 0x29c   : > { %v1283_v21 = vpop.xlane.xlu1 %1282 }
 0x29d   : > { %v1303_v22 = vsub.f32 %v4956_v18, %v1283_v21 }
 0x29e   : > { %v1280_v25 = vpop.xlane.xlu0 %1279 }
 0x29f   : > { %v1312_v27 = vmul.f32 1.442695, %v1303_v22  ;;  %v1302_v35 = vsub.f32 %v4958_v20, %v1280_v25 }
 0x2a0   : > { %v1289_v58 = vpop.xlane.xlu1 %1288 }
 0x2a1   : > { %4420 = vpow2.f32 %v1312_v27  ;;  %v1310_v39 = vmul.f32 1.442695, %v1302_v35  ;;  %v1305_v60 = vsub.f32 %v4962_v23, %v1289_v58 }
 0x2a2   : > { %v1286_v43 = vpop.xlane.xlu0 %1285 }
 0x2a3   : > { %4422 = vpow2.f32 %v1310_v39  ;;  %v1316_v44 = vmul.f32 1.442695, %v1305_v60  ;;  %v1304_v59 = vsub.f32 %v4966_v31, %v1286_v43 }
 0x2a4   : > { %v1295_v61 = vpop.xlane.xlu1 %1294 }
 0x2a5   : > { %4424 = vpow2.f32 %v1316_v44  ;;  %v1314_v63 = vmul.f32 1.442695, %v1304_v59  ;;  %v1307_v2 = vsub.f32 %v4970_v41, %v1295_v61 }
 0x2a6   : > { %v1292_v18 = vpop.xlane.xlu0 %1291 }
 0x2a7   : > { %4426 = vpow2.f32 %v1314_v63  ;;  %v1320_v0 = vmul.f32 1.442695, %v1307_v2  ;;  %v1306_v20 = vsub.f32 %v4974_v57, %v1292_v18 }
 0x2a8   : > { %v1301_v4 = vpop.xlane.xlu1 %1300 }
 0x2a9   : > { %4428 = vpow2.f32 %v1320_v0  ;;  %v1318_v5 = vmul.f32 1.442695, %v1306_v20  ;;  %v1309_v23 = vsub.f32 %v4978_v62, %v1301_v4 }
 0x2aa   : > { %v1298_v6 = vpop.xlane.xlu0 %1297 }
 0x2ab   : > { %4430 = vpow2.f32 %v1318_v5  ;;  %v1324_v7 = vmul.f32 1.442695, %v1309_v23  ;;  %v1308_v31 = vsub.f32 %v4982_v3, %v1298_v6 }
 0x2ad   : > { %4432 = vpow2.f32 %v1324_v7  ;;  %v1322_v12 = vmul.f32 1.442695, %v1308_v31 }
 0x2ae   : > { %v5036_v13 = vpop.eup %4420 }
 0x2af   : > { %4434 = vpow2.f32 %v1322_v12  ;;  %v1329_v41 = vsel %vm903_vm3, %v5036_v13, 0.0 }
 0x2b0   : > { %v5040_v17 = vpop.eup %4422  ;;  %1330 = vadd.xlane.f32.xlu1 %v1329_v41 }
 0x2b1   : > { %v1326_v57 = vsel %vm903_vm3, %v5040_v17, 0.0 }
 0x2b2   : > { %v5044_v62 = vpop.eup %4424  ;;  %1327 = vadd.xlane.f32.xlu0 %v1326_v57 }
 0x2b3   : > { %v1335_v3 = vsel %vm903_vm3, %v5044_v62, 0.0 }
 0x2b4   : > { %v5048_v19 = vpop.eup %4426  ;;  %1336 = vadd.xlane.f32.xlu1 %v1335_v3 }
 0x2b5   : > { %v1332_v21 = vsel %vm903_vm3, %v5048_v19, 0.0 }
 0x2b6   : > { %v5052_v22 = vpop.eup %4428  ;;  %1333 = vadd.xlane.f32.xlu0 %v1332_v21 }
 0x2b7   : > { %v1341_v25 = vsel %vm903_vm3, %v5052_v22, 0.0 }
 0x2b8   : > { %v5056_v27 = vpop.eup %4430  ;;  %1342 = vadd.xlane.f32.xlu1 %v1341_v25 }
 0x2b9   : > { %v1338_v35 = vsel %vm903_vm3, %v5056_v27, 0.0 }
 0x2ba   : > { %v5060_v58 = vpop.eup %4432  ;;  %1339 = vadd.xlane.f32.xlu0 %v1338_v35 }
 0x2bb   : > { %v1347_v39 = vsel %vm903_vm3, %v5060_v58, 0.0 }
 0x2bc   : > { %v5064_v60 = vpop.eup %4434  ;;  %1348 = vadd.xlane.f32.xlu1 %v1347_v39 }
 0x2bd   : > { %v1344_v43 = vsel %vm903_vm3, %v5064_v60, 0.0 }
 0x2be   : > { %1345 = vadd.xlane.f32.xlu0 %v1344_v43 }
 0x2c5   : > { %v957_v44 = vpop.xlane.xlu1 %956 }
 0x2c6   : > { %4436 = vrcp.f32 %v957_v44 }
 0x2c7   : > { %v954_v59 = vpop.xlane.xlu0 %953 }
 0x2c8   : > { %4438 = vrcp.f32 %v954_v59 }
 0x2cb   : > { %v963_v61 = vpop.xlane.xlu1 %962 }
 0x2cc   : > { %4440 = vrcp.f32 %v963_v61  ;;  %v960_v63 = vpop.xlane.xlu0 %959 }
 0x2cd   : > { %4442 = vrcp.f32 %v960_v63  ;;  %2074 = vrot.lane.b32.xlu1 %v4815_v29, %s4634_s28 }
 0x2cf   : > { %v969_v2 = vpop.xlane.xlu1 %968 }
 0x2d0   : > { %4444 = vrcp.f32 %v969_v2  ;;  %v966_v18 = vpop.xlane.xlu0 %965 }
 0x2d1   : > { %4446 = vrcp.f32 %v966_v18 }
 0x2d3   : > { %v975_v0 = vpop.xlane.xlu1 %974  ;;  %v4437_v20 = vpop.eup %4436 }
 0x2d4   : > { %4448 = vrcp.f32 %v975_v0  ;;  %v972_v4 = vpop.xlane.xlu0 %971  ;;  %1367 = vrot.lane.b32.xlu0 %v4853_v38, %s4634_s28  ;;  %v985_v6 = vmul.f32 %v4437_v20, %v4996_v1 }
 0x2d5   : > { %v4439_v5 = vpop.eup %4438  ;;  %4450 = vrcp.f32 %v972_v4 }
 0x2d6   : > { %v984_v23 = vmul.f32 %v4439_v5, %v5000_v8 }
 0x2d8   : > { %4152 = vmatprep.mubr.msk.f32.mxu1 %vm903_vm3, %v984_v23 }
 0x2d9   : > { %v4441_v7 = vpop.eup %4440  ;;  %4153 = vmatmul.mubr.msk.f32.vlgmr.msra.gmra.mxu1 %vm903_vm3, %v985_v6 }
 0x2da   : > { %v4443_v31 = vpop.eup %4442  ;;  %v987_v12 = vmul.f32 %v4441_v7, %v5004_v10 }
 0x2db   : > { %v986_v41 = vmul.f32 %v4443_v31, %v5006_v14 }
 0x2dd   : > { %v4445_v57 = vpop.eup %4444  ;;  %4155 = vmatprep.mubr.msk.f32.mxu1 %vm903_vm3, %v986_v41 }
 0x2de   : > { %v4447_v38 = vpop.eup %4446  ;;  %4156 = vmatmul.mubr.msk.f32.gmra.mxu1 %vm903_vm3, %v987_v12  ;;  %v989_v8 = vmul.f32 %v4445_v57, %v5012_v9 }
 0x2df   : > { %v988_v1 = vmul.f32 %v4447_v38, %v5014_v11 }
 0x2e1   : > { %v4449_v3 = vpop.eup %4448  ;;  %4158 = vmatprep.mubr.msk.f32.mxu1 %vm903_vm3, %v988_v1 }
 0x2e2   : > { %v4451_v21 = vpop.eup %4450  ;;  %4159 = vmatmul.mubr.msk.f32.gmra.mxu1 %vm903_vm3, %v989_v8  ;;  %v991_v10 = vmul.f32 %v4449_v3, %v5020_v15 }
 0x2e3   : > { %v990_v14 = vmul.f32 %v4451_v21, %v5022_v16 }
 0x2e5   : > { %4161 = vmatprep.mubr.msk.f32.mxu1 %vm903_vm3, %v990_v14 }
 0x2e6   : > { %4162 = vmatmul.mubr.msk.f32.gmra.mxu1 %vm903_vm3, %v991_v10 }
 0x339   : > { %v1331_v25 = vpop.xlane.xlu1 %1330 }
 0x33a   : > { %4452 = vrcp.f32 %v1331_v25 }
 0x33b   : > { %v1328_v35 = vpop.xlane.xlu0 %1327 }
 0x33c   : > { %4454 = vrcp.f32 %v1328_v35 }
 0x33d   : > { %v1337_v9 = vpop.xlane.xlu1 %1336 }
 0x33e   : > { %4456 = vrcp.f32 %v1337_v9 }
 0x33f   : > { %v1334_v11 = vpop.xlane.xlu0 %1333 }
 0x340   : > { %4458 = vrcp.f32 %v1334_v11 }
 0x341   : > { %v1343_v39 = vpop.xlane.xlu1 %1342 }
 0x342   : > { %4460 = vrcp.f32 %v1343_v39 }
 0x343   : > { %v1340_v43 = vpop.xlane.xlu0 %1339 }
 0x344   : > { %4462 = vrcp.f32 %v1340_v43 }
 0x345   : > { %v1349_v44 = vpop.xlane.xlu1 %1348 }
 0x346   : > { %4464 = vrcp.f32 %v1349_v44 }
 0x347   : > { %v1346_v15 = vpop.xlane.xlu0 %1345  ;;  %v4453_v16 = vpop.eup %4452 }
 0x348   : > { %4466 = vrcp.f32 %v1346_v15  ;;  %v1359_v18 = vmul.f32 %v4453_v16, %v5036_v13 }
 0x349   : > { %v4455_v59 = vpop.eup %4454  ;;  %v2075_v4 = vpop.permute.xlu1 %2074 }
 0x34a   : > { %v1358_v61 = vmul.f32 %v4455_v59, %v5040_v17 }
 0x34b   : > { %v1368_v63 = vpop.permute.xlu0 %1367  ;;  %v4457_v2 = vpop.eup %4456 }
 0x34c   : > { %4178 = vmatprep.subr.mxu1 %v1368_v63  ;;  %4180 = vmatprep.mubr.msk.f32.mxu1 %vm903_vm3, %v1358_v61  ;;  %v1361_v13 = vmul.f32 %v4457_v2, %v5044_v62 }
 0x34d   : > { %v4459_v0 = vpop.eup %4458  ;;  %4179 = vmatpush3.msra.mxu1 %v1368_v63 }
 0x34e   : > { %4181 = vmatmul.mubr.msk.f32.vlgmr.msra.gmra.mxu1 %vm903_vm3, %v1359_v18  ;;  %4212 = vmatprep.subr.msk.mxu1 %vm762_vm2, %v4815_v29  ;;  %v1360_v20 = vmul.f32 %v4459_v0, %v5048_v19 }
 0x34f   : > { %4213 = vmatpush3.xpose.msk.msra.mxu1 %vm762_vm2, %v4815_v29  ;;  %v4461_v17 = vpop.eup %4460 }
 0x350   : > { %4183 = vmatprep.mubr.msk.f32.mxu1 %vm903_vm3, %v1360_v20  ;;  %4240 = vmatprep.subr.msk.mxu1 %vm762_vm2, %v2075_v4  ;;  %v1363_v19 = vmul.f32 %v4461_v17, %v5052_v22 }
 0x351   : > { %v4463_v5 = vpop.eup %4462 }
 0x352   : > { %4184 = vmatmul.mubr.msk.f32.gmra.mxu1 %vm903_vm3, %v1361_v13  ;;  %v1362_v23 = vmul.f32 %v4463_v5, %v5056_v27 }
 0x353   : > { %v4465_v6 = vpop.eup %4464 }
 0x354   : > { %4186 = vmatprep.mubr.msk.f32.mxu1 %vm903_vm3, %v1362_v23  ;;  %v1365_v31 = vmul.f32 %v4465_v6, %v5060_v58 }
 0x355   : > { %v4467_v7 = vpop.eup %4466 }
 0x356   : > { %4187 = vmatmul.mubr.msk.f32.gmra.mxu1 %vm903_vm3, %v1363_v19  ;;  %v1364_v29 = vmul.f32 %v4467_v7, %v5064_v60 }
 0x358   : > { %4189 = vmatprep.mubr.msk.f32.mxu1 %vm903_vm3, %v1364_v29 }
 0x35a   : > { %4190 = vmatmul.mubr.msk.f32.gmra.mxu1 %vm903_vm3, %v1365_v31 }
 0x35b   : > { %4214 = vmatprep.mubr.msk.f32.mxu1 %vm762_vm2, %v4801_v26 }
 0x35e   : > { %4215 = vmatmul.mubr.msk.f32.vlgmr.msra.gmra.mxu1 %vm762_vm2, %v4796_v24 }
 0x35f   : > { %4241 = vmatpush3.xpose.msk.msra.mxu1 %vm762_vm2, %v2075_v4  ;;  %4217 = vmatprep.mubr.msk.f32.mxu1 %vm762_vm2, %v4817_v30 }
 0x360   : > { %4268 = vmatprep.subr.mxu1 %v4864_v45 }
 0x362   : > { %4218 = vmatmul.mubr.msk.f32.gmra.mxu1 %vm762_vm2, %v4809_v28 }
 0x363   : > { %4220 = vmatprep.mubr.msk.f32.mxu1 %vm762_vm2, %v4831_v34 }
 0x366   : > { %4221 = vmatmul.mubr.msk.f32.gmra.mxu1 %vm762_vm2, %v4823_v32 }
 0x367   : > { %4223 = vmatprep.mubr.msk.f32.mxu1 %vm762_vm2, %v4843_v37 }
 0x36a   : > { %4224 = vmatmul.mubr.msk.f32.gmra.mxu1 %vm762_vm2, %v4837_v36 }
 0x36b   : > { %4242 = vmatprep.mubr.msk.f32.mxu1 %vm762_vm2, %v4871_v47 }
 0x36e   : > { %4243 = vmatmul.mubr.msk.f32.vlgmr.msra.gmra.mxu1 %vm762_vm2, %v4867_v46 }
 0x36f   : > { %4269 = vmatpush3.msra.mxu1 %v4864_v45  ;;  %4245 = vmatprep.mubr.msk.f32.mxu1 %vm762_vm2, %v4880_v49 }
 0x370   : > { %4270 = vmatprep.subr.mxu1 %v4878_v48 }
 0x371   : > { %4271 = vmatpush3.msra.mxu1 %v4878_v48 }
 0x372   : > { %4272 = vmatprep.subr.mxu1 %v4890_v50  ;;  %4246 = vmatmul.mubr.msk.f32.gmra.mxu1 %vm762_vm2, %v4892_v51 }
 0x373   : > { %4273 = vmatpush3.msra.mxu1 %v4890_v50  ;;  %4248 = vmatprep.mubr.msk.f32.mxu1 %vm762_vm2, %v4901_v53 }
 0x374   : > { %4274 = vmatprep.subr.mxu1 %v4899_v52 }
 0x375   : > { %4275 = vmatpush3.msra.mxu1 %v4899_v52 }
 0x376   : > { %4302 = vmatprep.subr.mxu1 %v4859_v42  ;;  %4249 = vmatmul.mubr.msk.f32.gmra.mxu1 %vm762_vm2, %v4909_v54 }
 0x377   : > { %4251 = vmatprep.mubr.msk.f32.mxu1 %vm762_vm2, %v4915_v55 }
 0x37a   : > { %4252 = vmatmul.mubr.msk.f32.gmra.mxu1 %vm762_vm2, %v4920_v56 }
 0x399   : > { %v4154_v45 = vpop.f32.mrf.mxu1 }
 0x39a   : > { %1122 = vst.msk [vmem:[#allocation2 + $0x8] sm:$0xff] %vm762_vm2, %v4154_v45 }
 0x39b   : > { %v1082_v48 = vpop.f32.mrf.mxu1 }
 0x39c   : > { %1121 = vst.msk [vmem:[#allocation2] sm:$0xff] %vm762_vm2, %v1082_v48 }
 0x39e   : > { %v4157_v50 = vpop.f32.mrf.mxu1 }
 0x39f   : > { %1124 = vst.msk [vmem:[#allocation2 + $0x18] sm:$0xff] %vm762_vm2, %v4157_v50 }
 0x3a0   : > { %v1092_v52 = vpop.f32.mrf.mxu1 }
 0x3a1   : > { %1123 = vst.msk [vmem:[#allocation2 + $0x10] sm:$0xff] %vm762_vm2, %v1092_v52 }
 0x3a2   : > { %v4160_v62 = vpop.f32.mrf.mxu1 }
 0x3a3   : > { %1126 = vst.msk [vmem:[#allocation2 + $0x28] sm:$0xff] %vm762_vm2, %v4160_v62 }
 0x3a4   : > { %v1102_v22 = vpop.f32.mrf.mxu1 }
 0x3a5   : > { %1125 = vst.msk [vmem:[#allocation2 + $0x20] sm:$0xff] %vm762_vm2, %v1102_v22 }
 0x3a6   : > { %v4163_v27 = vpop.f32.mrf.mxu1 }
 0x3a7   : > { %1128 = vst.msk [vmem:[#allocation2 + $0x38] sm:$0xff] %vm762_vm2, %v4163_v27 }
 0x3a8   : > { %v1112_v58 = vpop.f32.mrf.mxu1 }
 0x3a9   : > { %1127 = vst.msk [vmem:[#allocation2 + $0x30] sm:$0xff] %vm762_vm2, %v1112_v58 }
 0x40e   : > { %v4182_v60 = vpop.f32.mrf.mxu1 }
 0x40f   : > { %1509 = vrot.lane.b32.xlu1 %v4182_v60, %s4635_s20 }
 0x410   : > { %v1460_v12 = vpop.f32.mrf.mxu1 }
 0x411   : > { %1507 = vrot.lane.b32.xlu0 %v1460_v12, %s4635_s20 }
 0x412   : > { %v4185_v41 = vpop.f32.mrf.mxu1 }
 0x414   : > { %v1470_v57 = vpop.f32.mrf.mxu1 }
 0x415   : > { %1513 = vrot.lane.b32.xlu0 %v4185_v41, %s4635_s20  ;;  %1511 = vrot.lane.b32.xlu1 %v1470_v57, %s4635_s20 }
 0x416   : > { %v5163_v38 = vpop.f32.mrf.mxu1 }
 0x418   : > { %v1480_v8 = vpop.f32.mrf.mxu1 }
 0x419   : > { %1515 = vrot.lane.b32.xlu1 %v1480_v8, %s4635_s20 }
 0x41a   : > { %v5166_v1 = vpop.f32.mrf.mxu1 }
 0x41c   : > { %v5168_v3 = vpop.f32.mrf.mxu1 }
 0x41e   : > { %v4216_v21 = vpop.f32.mrf.mxu1 }
 0x41f   : > { %v5170_v44 = vmul.f32 0.25, %v4216_v21 }
 0x420   : > { %v1802_v10 = vpop.f32.mrf.mxu1 }
 0x421   : > { %v1852_v59 = vsel %vm903_vm3, %v5170_v44, -inf  ;;  %v5180_v18 = vmul.f32 0.25, %v1802_v10 }
 0x422   : > { %v4219_v14 = vpop.f32.mrf.mxu1 }
 0x423   : > { %v5186_v17 = vmul.f32 0.25, %v4219_v14  ;;  %v1849_v5 = vsel %vm903_vm3, %v5180_v18, -inf }
 0x424   : > { %v1812_v25 = vpop.f32.mrf.mxu1 }
 0x425   : > { %v5172_v16 = vmul.f32 0.25, %v1812_v25  ;;  %v1858_v29 = vsel %vm903_vm3, %v5186_v17, -inf }
 0x426   : > { %v4222_v35 = vpop.f32.mrf.mxu1 }
 0x427   : > { %v1855_v2 = vsel %vm903_vm3, %v5172_v16, -inf  ;;  %v5194_v19 = vmul.f32 0.25, %v4222_v35 }
 0x428   : > { %v1822_v9 = vpop.f32.mrf.mxu1 }
 0x429   : > { %v5176_v63 = vmul.f32 0.25, %v1822_v9  ;;  %v1864_v52 = vsel %vm903_vm3, %v5194_v19, -inf }
 0x42a   : > { %v4225_v11 = vpop.f32.mrf.mxu1 }
 0x42b   : > { %v1861_v4 = vsel %vm903_vm3, %v5176_v63, -inf  ;;  %v5202_v48 = vmul.f32 0.25, %v4225_v11 }
 0x42c   : > { %v1832_v39 = vpop.f32.mrf.mxu1 }
 0x42d   : > { %v5182_v20 = vmul.f32 0.25, %v1832_v39  ;;  %v1870_v60 = vsel %vm903_vm3, %v5202_v48, -inf }
 0x42e   : > { %v4244_v43 = vpop.f32.mrf.mxu1 }
 0x42f   : > { %v1867_v6 = vsel %vm903_vm3, %v5182_v20, -inf  ;;  %v5210_v27 = vmul.f32 0.25, %v4244_v43 }
 0x430   : > { %v2144_v15 = vpop.f32.mrf.mxu1 }
 0x431   : > { %v5190_v23 = vmul.f32 0.25, %v2144_v15  ;;  %v2194_v8 = vsel %vm903_vm3, %v5210_v27, -inf }
 0x432   : > { %v4247_v61 = vpop.f32.mrf.mxu1 }
 0x433   : > { %v2191_v45 = vsel %vm903_vm3, %v5190_v23, -inf  ;;  %v5218_v57 = vmul.f32 0.25, %v4247_v61 }
 0x434   : > { %1853 = vmax.xlane.f32.xlu0 %v1852_v59  ;;  %v2154_v0 = vpop.f32.mrf.mxu1 }
 0x435   : > { %v5198_v31 = vmul.f32 0.25, %v2154_v0  ;;  %v2200_v14 = vsel %vm903_vm3, %v5218_v57, -inf }
 0x436   : > { %v4250_v13 = vpop.f32.mrf.mxu1 }
 0x437   : > { %v2197_v22 = vsel %vm903_vm3, %v5198_v31, -inf  ;;  %v5224_v10 = vmul.f32 0.25, %v4250_v13 }
 0x438   : > { %1856 = vmax.xlane.f32.xlu0 %v1855_v2  ;;  %v2164_v7 = vpop.f32.mrf.mxu1 }
 0x439   : > { %v5206_v62 = vmul.f32 0.25, %v2164_v7  ;;  %v2206_v35 = vsel %vm903_vm3, %v5224_v10, -inf }
 0x43a   : > { %v4253_v50 = vpop.f32.mrf.mxu1 }
 0x43b   : > { %v2203_v41 = vsel %vm903_vm3, %v5206_v62, -inf  ;;  %v5228_v25 = vmul.f32 0.25, %v4253_v50 }
 0x43c   : > { %1862 = vmax.xlane.f32.xlu0 %v1861_v4  ;;  %v2174_v58 = vpop.f32.mrf.mxu1 }
 0x43d   : > { %1850 = vmax.xlane.f32.xlu1 %v1849_v5  ;;  %v5214_v12 = vmul.f32 0.25, %v2174_v58  ;;  %v2212_v9 = vsel %vm903_vm3, %v5228_v25, -inf }
 0x43f   : > { %v2209_v21 = vsel %vm903_vm3, %v5214_v12, -inf }
 0x440   : > { %1868 = vmax.xlane.f32.xlu0 %v1867_v6 }
 0x441   : > { %1859 = vmax.xlane.f32.xlu1 %v1858_v29 }
 0x444   : > { %2192 = vmax.xlane.f32.xlu0 %v2191_v45 }
 0x445   : > { %1865 = vmax.xlane.f32.xlu1 %v1864_v52 }
 0x448   : > { %2198 = vmax.xlane.f32.xlu0 %v2197_v22 }
 0x449   : > { %1871 = vmax.xlane.f32.xlu1 %v1870_v60 }
 0x44c   : > { %2204 = vmax.xlane.f32.xlu0 %v2203_v41 }
 0x44d   : > { %2195 = vmax.xlane.f32.xlu1 %v2194_v8 }
 0x450   : > { %2210 = vmax.xlane.f32.xlu0 %v2209_v21 }
 0x451   : > { %2201 = vmax.xlane.f32.xlu1 %v2200_v14 }
 0x455   : > { %2207 = vmax.xlane.f32.xlu1 %v2206_v35 }
 0x459   : > { %2213 = vmax.xlane.f32.xlu1 %v2212_v9 }
 0x466   : > { %1519 = vrot.lane.b32.xlu0 %v5168_v3, %s4635_s20 }
 0x46a   : > { %1517 = vrot.lane.b32.xlu1 %v5163_v38, %s4635_s20 }
 0x46e   : > { %1521 = vrot.lane.b32.xlu1 %v5166_v1, %s4635_s20 }
 0x481   : > { %v1510_v11 = vpop.permute.xlu1 %1509 }
 0x482   : > { %1533 = vst.msk [vmem:[#allocation2 + $0x8] sm:$0xff] %vm1531_vm4, %v1510_v11 }
 0x483   : > { %v1508_v39 = vpop.permute.xlu0 %1507 }
 0x484   : > { %1532 = vst.msk [vmem:[#allocation2] sm:$0xff] %vm1531_vm4, %v1508_v39 }
 0x487   : > { %v1514_v43 = vpop.permute.xlu0 %1513  ;;  %v1512_v15 = vpop.permute.xlu1 %1511 }
 0x488   : > { %1535 = vst.msk [vmem:[#allocation2 + $0x18] sm:$0xff] %vm1531_vm4, %v1514_v43  ;;  %1534 = vst.msk [vmem:[#allocation2 + $0x10] sm:$0xff] %vm1531_vm4, %v1512_v15 }
 0x489   : > { %v1541_v38 = vld [vmem:[#allocation2 + $0x8] sm:$0xff] }
 0x48b   : > { %v1516_v3 = vpop.permute.xlu1 %1515  ;;  %v1540_v59 = vld [vmem:[#allocation2] sm:$0xff] }
 0x48c   : > { %1536 = vst.msk [vmem:[#allocation2 + $0x20] sm:$0xff] %vm1531_vm4, %v1516_v3  ;;  %4200 = vmatprep.mubr.msk.f32.mxu0 %vm460_vm0, %v1540_v59 }
 0x48d   : > { %4201 = vmatmul.mubr.msk.f32.vlgmr.msra.gmra.mxu0 %vm460_vm0, %v1541_v38 }
 0x48e   : > { %4227 = vmatpush3.msra.mxu0 %v4857_v40 }
 0x48f   : > { %v1542_v1 = vld [vmem:[#allocation2 + $0x10] sm:$0xff]  ;;  %v1543_v61 = vld [vmem:[#allocation2 + $0x18] sm:$0xff] }
 0x490   : > { %4203 = vmatprep.mubr.msk.f32.mxu0 %vm460_vm0, %v1542_v1 }
 0x491   : > { %4204 = vmatmul.mubr.msk.f32.gmra.mxu0 %vm460_vm0, %v1543_v61 }
 0x493   : > { %v1544_v2 = vld [vmem:[#allocation2 + $0x20] sm:$0xff] }
 0x494   : > { %4206 = vmatprep.mubr.msk.f32.mxu0 %vm460_vm0, %v1544_v2 }
 0x4bd   : > { %v1854_v0 = vpop.xlane.xlu0 %1853 }
 0x4be   : > { %v1874_v4 = vsub.f32 %v5170_v44, %v1854_v0 }
 0x4c0   : > { %v1883_v13 = vmul.f32 1.442695, %v1874_v4 }
 0x4c1   : > { %v1857_v5 = vpop.xlane.xlu0 %1856 }
 0x4c2   : > { %4468 = vpow2.f32 %v1883_v13  ;;  %v1875_v6 = vsub.f32 %v5172_v16, %v1857_v5 }
 0x4c4   : > { %v1885_v7 = vmul.f32 1.442695, %v1875_v6 }
 0x4c5   : > { %v1863_v29 = vpop.xlane.xlu0 %1862 }
 0x4c6   : > { %4470 = vpow2.f32 %v1885_v7  ;;  %v1851_v45 = vpop.xlane.xlu1 %1850  ;;  %v1877_v44 = vsub.f32 %v5176_v63, %v1863_v29 }
 0x4c7   : > { %v1873_v50 = vsub.f32 %v5180_v18, %v1851_v45 }
 0x4c8   : > { %v1889_v11 = vmul.f32 1.442695, %v1877_v44 }
 0x4c9   : > { %v1881_v52 = vmul.f32 1.442695, %v1873_v50  ;;  %v1869_v22 = vpop.xlane.xlu0 %1868 }
 0x4ca   : > { %v1879_v58 = vsub.f32 %v5182_v20, %v1869_v22  ;;  %v1860_v60 = vpop.xlane.xlu1 %1859 }
 0x4cb   : > { %4472 = vpow2.f32 %v1881_v52  ;;  %v1876_v41 = vsub.f32 %v5186_v17, %v1860_v60 }
 0x4cc   : > { %v1893_v8 = vmul.f32 1.442695, %v1879_v58 }
 0x4cd   : > { %v1887_v21 = vmul.f32 1.442695, %v1876_v41  ;;  %v2193_v14 = vpop.xlane.xlu0 %2192 }
 0x4ce   : > { %v1866_v16 = vpop.xlane.xlu1 %1865 }
 0x4cf   : > { %v5257_v35 = vpop.eup %4468  ;;  %4474 = vpow2.f32 %v1887_v21  ;;  %v1878_v9 = vsub.f32 %v5194_v19, %v1866_v16  ;;  %v2215_v19 = vsub.f32 %v5190_v23, %v2193_v14 }
 0x4d0   : > { %v1900_v18 = vsel %vm903_vm3, %v5257_v35, 0.0  ;;  %4476 = vpow2.f32 %v1893_v8 }
 0x4d1   : > { %v1891_v20 = vmul.f32 1.442695, %v1878_v9  ;;  %1901 = vadd.xlane.f32.xlu1 %v1900_v18  ;;  %v2199_v39 = vpop.xlane.xlu0 %2198  ;;  %v2223_v0 = vmul.f32 1.442695, %v2215_v19 }
 0x4d2   : > { %v1872_v17 = vpop.xlane.xlu1 %1871  ;;  %v2217_v2 = vsub.f32 %v5198_v31, %v2199_v39 }
 0x4d3   : > { %v5262_v43 = vpop.eup %4470  ;;  %4478 = vpow2.f32 %v1891_v20  ;;  %v1880_v63 = vsub.f32 %v5202_v48, %v1872_v17 }
 0x4d4   : > { %v1903_v15 = vsel %vm903_vm3, %v5262_v43, 0.0  ;;  %4480 = vpow2.f32 %v1889_v11  ;;  %v2227_v7 = vmul.f32 1.442695, %v2217_v2 }
 0x4d5   : > { %v1895_v3 = vmul.f32 1.442695, %v1880_v63  ;;  %1904 = vadd.xlane.f32.xlu1 %v1903_v15  ;;  %v2205_v59 = vpop.xlane.xlu0 %2204 }
 0x4d6   : > { %v2196_v38 = vpop.xlane.xlu1 %2195 }
 0x4d7   : > { %v2216_v1 = vsub.f32 %v5210_v27, %v2196_v38  ;;  %4482 = vpow2.f32 %v1895_v3  ;;  %v2219_v27 = vsub.f32 %v5206_v62, %v2205_v59 }
 0x4d8   : > { %v5269_v61 = vpop.eup %4472 }
 0x4d9   : > { %v2225_v4 = vmul.f32 1.442695, %v2216_v1  ;;  %v2211_v48 = vpop.xlane.xlu0 %2210  ;;  %v1897_v13 = vsel %vm903_vm3, %v5269_v61, 0.0  ;;  %v2231_v58 = vmul.f32 1.442695, %v2219_v27 }
 0x4da   : > { %v2202_v5 = vpop.xlane.xlu1 %2201  ;;  %1898 = vadd.xlane.f32.xlu0 %v1897_v13 }
 0x4db   : > { %4484 = vpow2.f32 %v2225_v4  ;;  %v2218_v23 = vsub.f32 %v5218_v57, %v2202_v5 }
 0x4dc   : > { %v5275_v6 = vpop.eup %4474  ;;  %4486 = vpow2.f32 %v2223_v0 }
 0x4dd   : > { %v2229_v29 = vmul.f32 1.442695, %v2218_v23  ;;  %v1520_v31 = vpop.permute.xlu0 %1519  ;;  %v1906_v45 = vsel %vm903_vm3, %v5275_v6, 0.0  ;;  %v5280_v50 = vpop.eup %4476 }
 0x4de   : > { %1538 = vst.msk [vmem:[#allocation2 + $0x30] sm:$0xff] %vm1531_vm4, %v1520_v31  ;;  %v2208_v52 = vpop.xlane.xlu1 %2207  ;;  %1907 = vadd.xlane.f32.xlu0 %v1906_v45  ;;  %v1915_v41 = vsel %vm903_vm3, %v5280_v50, 0.0 }
 0x4df   : > { %4488 = vpow2.f32 %v2229_v29  ;;  %v2220_v57 = vsub.f32 %v5224_v10, %v2208_v52  ;;  %v2221_v10 = vsub.f32 %v5214_v12, %v2211_v48 }
 0x4e0   : > { %v5284_v22 = vpop.eup %4478  ;;  %4490 = vpow2.f32 %v2227_v7 }
 0x4e1   : > { %v2233_v60 = vmul.f32 1.442695, %v2220_v57  ;;  %v1912_v62 = vsel %vm903_vm3, %v5284_v22, 0.0  ;;  %v5290_v44 = vpop.eup %4480  ;;  %v2235_v20 = vmul.f32 1.442695, %v2221_v10 }
 0x4e2   : > { %1913 = vadd.xlane.f32.xlu1 %v1912_v62  ;;  %v2214_v8 = vpop.xlane.xlu1 %2213  ;;  %1916 = vadd.xlane.f32.xlu0 %v1915_v41  ;;  %v1909_v16 = vsel %vm903_vm3, %v5290_v44, 0.0 }
 0x4e3   : > { %4492 = vpow2.f32 %v2233_v60  ;;  %v2222_v21 = vsub.f32 %v5228_v25, %v2214_v8 }
 0x4e4   : > { %4494 = vpow2.f32 %v2231_v58  ;;  %v5296_v9 = vpop.eup %4482 }
 0x4e5   : > { %v2237_v14 = vmul.f32 1.442695, %v2222_v21  ;;  %v1918_v25 = vsel %vm903_vm3, %v5296_v9, 0.0  ;;  %v1546_v38 = vld [vmem:[#allocation2 + $0x30] sm:$0xff] }
 0x4e6   : > { %1910 = vadd.xlane.f32.xlu1 %v1909_v16  ;;  %v1518_v18 = vpop.permute.xlu1 %1517 }
 0x4e7   : > { %1537 = vst.msk [vmem:[#allocation2 + $0x28] sm:$0xff] %vm1531_vm4, %v1518_v18  ;;  %4496 = vpow2.f32 %v2237_v14 }
 0x4e8   : > { %v5299_v11 = vpop.eup %4484  ;;  %4498 = vpow2.f32 %v2235_v20 }
 0x4e9   : > { %v2242_v12 = vsel %vm903_vm3, %v5299_v11, 0.0  ;;  %v5305_v39 = vpop.eup %4486 }
 0x4ea   : > { %1919 = vadd.xlane.f32.xlu1 %v1918_v25  ;;  %v1522_v17 = vpop.permute.xlu1 %1521  ;;  %2243 = vadd.xlane.f32.xlu0 %v2242_v12  ;;  %v2239_v3 = vsel %vm903_vm3, %v5305_v39, 0.0 }
 0x4eb   : > { %1539 = vst.msk [vmem:[#allocation2 + $0x38] sm:$0xff] %vm1531_vm4, %v1522_v17 }
 0x4ec   : > { %v5308_v63 = vpop.eup %4488 }
 0x4ed   : > { %v5310_v15 = vpop.eup %4490  ;;  %v2248_v19 = vsel %vm903_vm3, %v5308_v63, 0.0 }
 0x4ee   : > { %2249 = vadd.xlane.f32.xlu0 %v2248_v19  ;;  %2240 = vadd.xlane.f32.xlu1 %v2239_v3  ;;  %v1545_v59 = vld [vmem:[#allocation2 + $0x28] sm:$0xff]  ;;  %v2245_v0 = vsel %vm903_vm3, %v5310_v15, 0.0 }
 0x4ef   : > { %4207 = vmatmul.mubr.msk.f32.gmra.mxu0 %vm460_vm0, %v1545_v59 }
 0x4f0   : > { %v5317_v1 = vpop.eup %4492  ;;  %4209 = vmatprep.mubr.msk.f32.mxu0 %vm460_vm0, %v1546_v38 }
 0x4f1   : > { %v2254_v2 = vsel %vm903_vm3, %v5317_v1, 0.0  ;;  %v5324_v4 = vpop.eup %4494 }
 0x4f2   : > { %2255 = vadd.xlane.f32.xlu0 %v2254_v2  ;;  %2246 = vadd.xlane.f32.xlu1 %v2245_v0  ;;  %v1547_v48 = vld [vmem:[#allocation2 + $0x38] sm:$0xff]  ;;  %v2251_v13 = vsel %vm903_vm3, %v5324_v4, 0.0 }
 0x4f3   : > { %4210 = vmatmul.mubr.msk.f32.gmra.mxu0 %vm460_vm0, %v1547_v48 }
 0x4f4   : > { %v5329_v5 = vpop.eup %4496 }
 0x4f5   : > { %v2260_v23 = vsel %vm903_vm3, %v5329_v5, 0.0  ;;  %v5333_v7 = vpop.eup %4498 }
 0x4f6   : > { %2252 = vadd.xlane.f32.xlu0 %v2251_v13  ;;  %v2257_v27 = vsel %vm903_vm3, %v5333_v7, 0.0 }
 0x4fa   : > { %2261 = vadd.xlane.f32.xlu0 %v2260_v23 }
 0x4fe   : > { %2258 = vadd.xlane.f32.xlu0 %v2257_v27 }
 0x503   : > { %2978 = vrot.lane.b32.xlu1 %v4829_v33, %s4634_s28 }
 0x514   : > { %2280 = vrot.lane.b32.xlu0 %v4857_v40, %s4634_s28 }
 0x55a   : > { %v1902_v29 = vpop.xlane.xlu1 %1901 }
 0x55b   : > { %4500 = vrcp.f32 %v1902_v29 }
 0x55e   : > { %v1905_v31 = vpop.xlane.xlu1 %1904 }
 0x55f   : > { %4502 = vrcp.f32 %v1905_v31 }
 0x563   : > { %v1899_v45 = vpop.xlane.xlu0 %1898 }
 0x564   : > { %4504 = vrcp.f32 %v1899_v45 }
 0x567   : > { %v1908_v52 = vpop.xlane.xlu0 %1907 }
 0x568   : > { %4506 = vrcp.f32 %v1908_v52  ;;  %v4501_v60 = vpop.eup %4500 }
 0x569   : > { %v1930_v40 = vmul.f32 %v4501_v60, %v5257_v35 }
 0x56b   : > { %v1914_v57 = vpop.xlane.xlu1 %1913  ;;  %v1917_v58 = vpop.xlane.xlu0 %1916 }
 0x56c   : > { %4508 = vrcp.f32 %v1914_v57  ;;  %v4503_v41 = vpop.eup %4502 }
 0x56d   : > { %4510 = vrcp.f32 %v1917_v58  ;;  %v1931_v16 = vmul.f32 %v4503_v41, %v5262_v43 }
 0x56f   : > { %v1911_v62 = vpop.xlane.xlu1 %1910 }
 0x570   : > { %4512 = vrcp.f32 %v1911_v62 }
 0x571   : > { %v4505_v8 = vpop.eup %4504 }
 0x572   : > { %v1929_v21 = vmul.f32 %v4505_v8, %v5269_v61 }
 0x573   : > { %v1920_v10 = vpop.xlane.xlu1 %1919  ;;  %v2244_v14 = vpop.xlane.xlu0 %2243 }
 0x574   : > { %4514 = vrcp.f32 %v1920_v10  ;;  %4228 = vmatprep.mubr.msk.f32.mxu0 %vm903_vm3, %v1929_v21 }
 0x575   : > { %v4507_v18 = vpop.eup %4506  ;;  %4229 = vmatmul.mubr.msk.f32.vlgmr.msra.gmra.mxu0 %vm903_vm3, %v1930_v40 }
 0x576   : > { %4231 = vmatprep.mubr.msk.f32.mxu0 %vm903_vm3, %v1931_v16  ;;  %v1932_v20 = vmul.f32 %v4507_v18, %v5275_v6 }
 0x577   : > { %v2241_v25 = vpop.xlane.xlu1 %2240  ;;  %v2250_v12 = vpop.xlane.xlu0 %2249 }
 0x578   : > { %4516 = vrcp.f32 %v2241_v25 }
 0x579   : > { %4232 = vmatmul.mubr.msk.f32.gmra.mxu0 %vm903_vm3, %v1932_v20  ;;  %v4509_v35 = vpop.eup %4508  ;;  %4518 = vrcp.f32 %v2244_v14 }
 0x57a   : > { %v4511_v19 = vpop.eup %4510  ;;  %v1934_v38 = vmul.f32 %v4509_v35, %v5284_v22 }
 0x57b   : > { %v2247_v61 = vpop.xlane.xlu1 %2246  ;;  %v2256_v17 = vpop.xlane.xlu0 %2255  ;;  %v1935_v6 = vmul.f32 %v4511_v19, %v5280_v50 }
 0x57c   : > { %4520 = vrcp.f32 %v2247_v61 }
 0x57d   : > { %v4513_v3 = vpop.eup %4512  ;;  %4522 = vrcp.f32 %v2250_v12 }
 0x57e   : > { %v1933_v43 = vmul.f32 %v4513_v3, %v5290_v44 }
 0x57f   : > { %v2253_v59 = vpop.xlane.xlu0 %2252 }
 0x580   : > { %4234 = vmatprep.mubr.msk.f32.mxu0 %vm903_vm3, %v1933_v43  ;;  %4524 = vrcp.f32 %v2253_v59 }
 0x581   : > { %v4515_v2 = vpop.eup %4514  ;;  %4235 = vmatmul.mubr.msk.f32.gmra.mxu0 %vm903_vm3, %v1934_v38  ;;  %4526 = vrcp.f32 %v2256_v17 }
 0x582   : > { %4237 = vmatprep.mubr.msk.f32.mxu0 %vm903_vm3, %v1935_v6  ;;  %v1936_v0 = vmul.f32 %v4515_v2, %v5296_v9 }
 0x583   : > { %v2262_v48 = vpop.xlane.xlu0 %2261 }
 0x584   : > { %4528 = vrcp.f32 %v2262_v48 }
 0x585   : > { %v4517_v13 = vpop.eup %4516  ;;  %4238 = vmatmul.mubr.msk.f32.gmra.mxu0 %vm903_vm3, %v1936_v0 }
 0x586   : > { %v2271_v22 = vmul.f32 %v4517_v13, %v5305_v39  ;;  %v4519_v50 = vpop.eup %4518  ;;  %v2979_v39 = vpop.permute.xlu1 %2978 }
 0x587   : > { %v2259_v44 = vpop.xlane.xlu0 %2258  ;;  %v2272_v29 = vmul.f32 %v4519_v50, %v5299_v11 }
 0x588   : > { %4530 = vrcp.f32 %v2259_v44  ;;  %4256 = vmatprep.mubr.msk.f32.mxu0 %vm903_vm3, %v2271_v22 }
 0x589   : > { %v4521_v23 = vpop.eup %4520 }
 0x58a   : > { %v4523_v31 = vpop.eup %4522  ;;  %v2273_v9 = vmul.f32 %v4521_v23, %v5310_v15 }
 0x58b   : > { %v2281_v27 = vpop.permute.xlu0 %2280  ;;  %v2274_v11 = vmul.f32 %v4523_v31, %v5308_v63  ;;  %v4596_v63 = vld [vmem:[%s5872_s6 + $0x18] sm:$0xff] }
 0x58c   : > { %4254 = vmatprep.subr.mxu0 %v2281_v27 }
 0x58d   : > { %4255 = vmatpush3.msra.mxu0 %v2281_v27  ;;  %v4525_v45 = vpop.eup %4524 }
 0x58e   : > { %4257 = vmatmul.mubr.msk.f32.vlgmr.msra.gmra.mxu0 %vm903_vm3, %v2272_v29  ;;  %4288 = vmatprep.subr.msk.mxu0 %vm762_vm2, %v4829_v33  ;;  %v4527_v52 = vpop.eup %4526  ;;  %v2275_v57 = vmul.f32 %v4525_v45, %v5324_v4 }
 0x58f   : > { %4259 = vmatprep.mubr.msk.f32.mxu0 %vm903_vm3, %v2273_v9  ;;  %4289 = vmatpush3.xpose.msk.msra.mxu0 %vm762_vm2, %v4829_v33  ;;  %v2276_v58 = vmul.f32 %v4527_v52, %v5317_v1 }
 0x590   : > { %4316 = vmatprep.subr.msk.mxu0 %vm762_vm2, %v2979_v39 }
 0x591   : > { %v4529_v15 = vpop.eup %4528 }
 0x592   : > { %4260 = vmatmul.mubr.msk.f32.gmra.mxu0 %vm903_vm3, %v2274_v11  ;;  %v2278_v33 = vmul.f32 %v4529_v15, %v5329_v5 }
 0x593   : > { %4262 = vmatprep.mubr.msk.f32.mxu0 %vm903_vm3, %v2275_v57 }
 0x595   : > { %v4531_v60 = vpop.eup %4530 }
 0x596   : > { %4263 = vmatmul.mubr.msk.f32.gmra.mxu0 %vm903_vm3, %v2276_v58  ;;  %v2277_v62 = vmul.f32 %v4531_v60, %v5333_v7 }
 0x598   : > { %4265 = vmatprep.mubr.msk.f32.mxu0 %vm903_vm3, %v2277_v62 }
 0x59a   : > { %4266 = vmatmul.mubr.msk.f32.gmra.mxu0 %vm903_vm3, %v2278_v33 }
 0x59b   : > { %4290 = vmatprep.mubr.msk.f32.mxu0 %vm762_vm2, %v4801_v26  ;;  %v4598_v26 = vld [vmem:[%s5872_s6 + $0x8] sm:$0xff] }
 0x59e   : > { %4291 = vmatmul.mubr.msk.f32.vlgmr.msra.gmra.mxu0 %vm762_vm2, %v4796_v24  ;;  %v4597_v24 = vld [vmem:[%s5872_s6 + $0x10] sm:$0xff] }
 0x59f   : > { %4317 = vmatpush3.xpose.msk.msra.mxu0 %vm762_vm2, %v2979_v39  ;;  %4293 = vmatprep.mubr.msk.f32.mxu0 %vm762_vm2, %v4817_v30  ;;  %v5423_v30 = vpop.f32.mrf.mxu0 }
 0x5a0   : > { %4344 = vmatprep.subr.mxu0 %v4596_v63 }
 0x5a2   : > { %4294 = vmatmul.mubr.msk.f32.gmra.mxu0 %vm762_vm2, %v4809_v28  ;;  %v4599_v28 = vld [vmem:[%s5872_s6] sm:$0xff] }
 0x5a3   : > { %4296 = vmatprep.mubr.msk.f32.mxu0 %vm762_vm2, %v4831_v34 }
 0x5a6   : > { %4297 = vmatmul.mubr.msk.f32.gmra.mxu0 %vm762_vm2, %v4823_v32  ;;  %v5425_v32 = vpop.f32.mrf.mxu0 }
 0x5a7   : > { %4299 = vmatprep.mubr.msk.f32.mxu0 %vm762_vm2, %v4843_v37 }
 0x5a8   : > { %v5427_v34 = vpop.f32.mrf.mxu0 }
 0x5aa   : > { %4300 = vmatmul.mubr.msk.f32.gmra.mxu0 %vm762_vm2, %v4837_v36  ;;  %v5429_v36 = vpop.f32.mrf.mxu0 }
 0x5ab   : > { %4318 = vmatprep.mubr.msk.f32.mxu0 %vm762_vm2, %v4871_v47 }
 0x5ae   : > { %4319 = vmatmul.mubr.msk.f32.vlgmr.msra.gmra.mxu0 %vm762_vm2, %v4867_v46 }
 0x5af   : > { %4321 = vmatprep.mubr.msk.f32.mxu0 %vm762_vm2, %v4880_v49  ;;  %4345 = vmatpush3.msra.mxu0 %v4596_v63  ;;  %v5431_v37 = vpop.f32.mrf.mxu0 }
 0x5b0   : > { %4346 = vmatprep.subr.mxu0 %v4597_v24 }
 0x5b1   : > { %4347 = vmatpush3.msra.mxu0 %v4597_v24  ;;  %v5433_v46 = vpop.f32.mrf.mxu0 }
 0x5b2   : > { %4322 = vmatmul.mubr.msk.f32.gmra.mxu0 %vm762_vm2, %v4892_v51  ;;  %4348 = vmatprep.subr.mxu0 %v4598_v26 }
 0x5b3   : > { %4324 = vmatprep.mubr.msk.f32.mxu0 %vm762_vm2, %v4901_v53  ;;  %4349 = vmatpush3.msra.mxu0 %v4598_v26  ;;  %v5435_v47 = vpop.f32.mrf.mxu0 }
 0x5b4   : > { %4350 = vmatprep.subr.mxu0 %v4599_v28 }
 0x5b5   : > { %4351 = vmatpush3.msra.mxu0 %v4599_v28  ;;  %v5437_v49 = vpop.f32.mrf.mxu0 }
 0x5b6   : > { %4325 = vmatmul.mubr.msk.f32.gmra.mxu0 %vm762_vm2, %v4909_v54 }
 0x5b7   : > { %4327 = vmatprep.mubr.msk.f32.mxu0 %vm762_vm2, %v4915_v55 }
 0x5ba   : > { %4328 = vmatmul.mubr.msk.f32.gmra.mxu0 %vm762_vm2, %v4920_v56 }
 0x635   : > { %v4230_v51 = vpop.f32.mrf.mxu0 }
 0x636   : > { %2067 = vst.msk [vmem:[#allocation2 + $0x8] sm:$0xff] %vm762_vm2, %v4230_v51 }
 0x637   : > { %v2027_v53 = vpop.f32.mrf.mxu0 }
 0x638   : > { %2066 = vst.msk [vmem:[#allocation2] sm:$0xff] %vm762_vm2, %v2027_v53 }
 0x639   : > { %v4233_v54 = vpop.f32.mrf.mxu0 }
 0x63a   : > { %2069 = vst.msk [vmem:[#allocation2 + $0x18] sm:$0xff] %vm762_vm2, %v4233_v54 }
 0x63b   : > { %v2037_v55 = vpop.f32.mrf.mxu0 }
 0x63c   : > { %2068 = vst.msk [vmem:[#allocation2 + $0x10] sm:$0xff] %vm762_vm2, %v2037_v55 }
 0x641   : > { %v4236_v56 = vpop.f32.mrf.mxu0 }
 0x642   : > { %2071 = vst.msk [vmem:[#allocation2 + $0x28] sm:$0xff] %vm762_vm2, %v4236_v56 }
 0x643   : > { %v2047_v1 = vpop.f32.mrf.mxu0 }
 0x644   : > { %2070 = vst.msk [vmem:[#allocation2 + $0x20] sm:$0xff] %vm762_vm2, %v2047_v1 }
 0x645   : > { %v4239_v4 = vpop.f32.mrf.mxu0 }
 0x646   : > { %2073 = vst.msk [vmem:[#allocation2 + $0x38] sm:$0xff] %vm762_vm2, %v4239_v4 }
 0x647   : > { %v2057_v5 = vpop.f32.mrf.mxu0 }
 0x648   : > { %2072 = vst.msk [vmem:[#allocation2 + $0x30] sm:$0xff] %vm762_vm2, %v2057_v5 }
 0x64e   : > { %v4258_v7 = vpop.f32.mrf.mxu0 }
 0x64f   : > { %2422 = vrot.lane.b32.xlu1 %v4258_v7, %s4635_s20 }
 0x650   : > { %v2373_v41 = vpop.f32.mrf.mxu0 }
 0x651   : > { %2420 = vrot.lane.b32.xlu0 %v2373_v41, %s4635_s20 }
 0x652   : > { %v4261_v8 = vpop.f32.mrf.mxu0 }
 0x654   : > { %v2383_v21 = vpop.f32.mrf.mxu0 }
 0x655   : > { %2426 = vrot.lane.b32.xlu0 %v4261_v8, %s4635_s20  ;;  %2424 = vrot.lane.b32.xlu1 %v2383_v21, %s4635_s20 }
 0x656   : > { %v5451_v40 = vpop.f32.mrf.mxu0 }
 0x658   : > { %v2393_v10 = vpop.f32.mrf.mxu0 }
 0x659   : > { %2428 = vrot.lane.b32.xlu1 %v2393_v10, %s4635_s20 }
 0x65a   : > { %v5454_v14 = vpop.f32.mrf.mxu0 }
 0x65c   : > { %v5456_v16 = vpop.f32.mrf.mxu0 }
 0x65e   : > { %v4292_v18 = vpop.f32.mrf.mxu0 }
 0x65f   : > { %v5458_v43 = vmul.f32 0.25, %v4292_v18 }
 0x660   : > { %v2706_v20 = vpop.f32.mrf.mxu0 }
 0x661   : > { %v2756_v6 = vsel %vm903_vm3, %v5458_v43, -inf  ;;  %v5468_v13 = vmul.f32 0.25, %v2706_v20 }
 0x662   : > { %v4295_v25 = vpop.f32.mrf.mxu0 }
 0x663   : > { %v5474_v23 = vmul.f32 0.25, %v4295_v25  ;;  %v2753_v29 = vsel %vm903_vm3, %v5468_v13, -inf }
 0x664   : > { %v2716_v12 = vpop.f32.mrf.mxu0 }
 0x665   : > { %v5460_v38 = vmul.f32 0.25, %v2716_v12  ;;  %v2762_v11 = vsel %vm903_vm3, %v5474_v23, -inf }
 0x666   : > { %v4298_v35 = vpop.f32.mrf.mxu0 }
 0x667   : > { %v2759_v48 = vsel %vm903_vm3, %v5460_v38, -inf  ;;  %v5482_v45 = vmul.f32 0.25, %v4298_v35 }
 0x668   : > { %v2726_v61 = vpop.f32.mrf.mxu0 }
 0x669   : > { %v5464_v0 = vmul.f32 0.25, %v2726_v61  ;;  %v2768_v60 = vsel %vm903_vm3, %v5482_v45, -inf }
 0x66a   : > { %v4301_v17 = vpop.f32.mrf.mxu0 }
 0x66b   : > { %v2765_v50 = vsel %vm903_vm3, %v5464_v0, -inf  ;;  %v5490_v15 = vmul.f32 0.25, %v4301_v17 }
 0x66c   : > { %v2736_v19 = vpop.f32.mrf.mxu0 }
 0x66d   : > { %v5470_v44 = vmul.f32 0.25, %v2736_v19  ;;  %v2774_v26 = vsel %vm903_vm3, %v5490_v15, -inf }
 0x66e   : > { %v4320_v3 = vpop.f32.mrf.mxu0 }
 0x66f   : > { %v2771_v9 = vsel %vm903_vm3, %v5470_v44, -inf  ;;  %v5498_v63 = vmul.f32 0.25, %v4320_v3 }
 0x670   : > { %v3048_v59 = vpop.f32.mrf.mxu0 }
 0x671   : > { %v5478_v31 = vmul.f32 0.25, %v3048_v59  ;;  %v3098_v54 = vsel %vm903_vm3, %v5498_v63, -inf }
 0x672   : > { %v4323_v2 = vpop.f32.mrf.mxu0 }
 0x673   : > { %v3095_v57 = vsel %vm903_vm3, %v5478_v31, -inf  ;;  %v5506_v53 = vmul.f32 0.25, %v4323_v2 }
 0x674   : > { %2757 = vmax.xlane.f32.xlu0 %v2756_v6  ;;  %v3058_v22 = vpop.f32.mrf.mxu0 }
 0x675   : > { %v5486_v52 = vmul.f32 0.25, %v3058_v22  ;;  %v3104_v1 = vsel %vm903_vm3, %v5506_v53, -inf }
 0x676   : > { %v4326_v27 = vpop.f32.mrf.mxu0 }
 0x677   : > { %v3101_v33 = vsel %vm903_vm3, %v5486_v52, -inf  ;;  %v5512_v56 = vmul.f32 0.25, %v4326_v27 }
 0x678   : > { %2760 = vmax.xlane.f32.xlu0 %v2759_v48  ;;  %v3068_v39 = vpop.f32.mrf.mxu0 }
 0x679   : > { %v5494_v62 = vmul.f32 0.25, %v3068_v39  ;;  %v3110_v5 = vsel %vm903_vm3, %v5512_v56, -inf }
 0x67a   : > { %v4329_v58 = vpop.f32.mrf.mxu0 }
 0x67b   : > { %v3107_v51 = vsel %vm903_vm3, %v5494_v62, -inf  ;;  %v5516_v4 = vmul.f32 0.25, %v4329_v58 }
 0x67c   : > { %2766 = vmax.xlane.f32.xlu0 %v2765_v50  ;;  %v3078_v24 = vpop.f32.mrf.mxu0 }
 0x67d   : > { %2754 = vmax.xlane.f32.xlu1 %v2753_v29  ;;  %v5502_v28 = vmul.f32 0.25, %v3078_v24  ;;  %v3116_v7 = vsel %vm903_vm3, %v5516_v4, -inf }
 0x67f   : > { %v3113_v55 = vsel %vm903_vm3, %v5502_v28, -inf }
 0x680   : > { %2772 = vmax.xlane.f32.xlu0 %v2771_v9 }
 0x681   : > { %2763 = vmax.xlane.f32.xlu1 %v2762_v11 }
 0x684   : > { %3096 = vmax.xlane.f32.xlu0 %v3095_v57 }
 0x685   : > { %2769 = vmax.xlane.f32.xlu1 %v2768_v60 }
 0x688   : > { %3102 = vmax.xlane.f32.xlu0 %v3101_v33 }
 0x689   : > { %2775 = vmax.xlane.f32.xlu1 %v2774_v26 }
 0x68c   : > { %3108 = vmax.xlane.f32.xlu0 %v3107_v51 }
 0x68d   : > { %3099 = vmax.xlane.f32.xlu1 %v3098_v54 }
 0x690   : > { %3114 = vmax.xlane.f32.xlu0 %v3113_v55 }
 0x691   : > { %3105 = vmax.xlane.f32.xlu1 %v3104_v1 }
 0x695   : > { %3111 = vmax.xlane.f32.xlu1 %v3110_v5 }
 0x699   : > { %3117 = vmax.xlane.f32.xlu1 %v3116_v7 }
 0x6a6   : > { %2432 = vrot.lane.b32.xlu0 %v5456_v16, %s4635_s20 }
 0x6aa   : > { %2430 = vrot.lane.b32.xlu1 %v5451_v40, %s4635_s20 }
 0x6ae   : > { %2434 = vrot.lane.b32.xlu1 %v5454_v14, %s4635_s20 }
 0x6c1   : > { %v2423_v41 = vpop.permute.xlu1 %2422 }
 0x6c2   : > { %2445 = vst.msk [vmem:[#allocation2 + $0x8] sm:$0xff] %vm1531_vm4, %v2423_v41 }
 0x6c3   : > { %v2421_v8 = vpop.permute.xlu0 %2420 }
 0x6c4   : > { %2444 = vst.msk [vmem:[#allocation2] sm:$0xff] %vm1531_vm4, %v2421_v8 }
 0x6c7   : > { %v2427_v21 = vpop.permute.xlu0 %2426  ;;  %v2425_v10 = vpop.permute.xlu1 %2424 }
 0x6c8   : > { %2447 = vst.msk [vmem:[#allocation2 + $0x18] sm:$0xff] %vm1531_vm4, %v2427_v21  ;;  %2446 = vst.msk [vmem:[#allocation2 + $0x10] sm:$0xff] %vm1531_vm4, %v2425_v10 }
 0x6c9   : > { %v2453_v40 = vld [vmem:[#allocation2 + $0x8] sm:$0xff] }
 0x6cb   : > { %v2429_v18 = vpop.permute.xlu1 %2428  ;;  %v2452_v16 = vld [vmem:[#allocation2] sm:$0xff] }
 0x6cc   : > { %2448 = vst.msk [vmem:[#allocation2 + $0x20] sm:$0xff] %vm1531_vm4, %v2429_v18  ;;  %4276 = vmatprep.mubr.msk.f32.mxu1 %vm460_vm0, %v2452_v16 }
 0x6cd   : > { %4277 = vmatmul.mubr.msk.f32.vlgmr.msra.gmra.mxu1 %vm460_vm0, %v2453_v40 }
 0x6ce   : > { %4303 = vmatpush3.msra.mxu1 %v4859_v42 }
 0x6cf   : > { %v2454_v14 = vld [vmem:[#allocation2 + $0x10] sm:$0xff]  ;;  %v2455_v20 = vld [vmem:[#allocation2 + $0x18] sm:$0xff] }
 0x6d0   : > { %4279 = vmatprep.mubr.msk.f32.mxu1 %vm460_vm0, %v2454_v14 }
 0x6d1   : > { %4280 = vmatmul.mubr.msk.f32.gmra.mxu1 %vm460_vm0, %v2455_v20 }
 0x6d3   : > { %v2456_v25 = vld [vmem:[#allocation2 + $0x20] sm:$0xff] }
 0x6d4   : > { %4282 = vmatprep.mubr.msk.f32.mxu1 %vm460_vm0, %v2456_v25 }
 0x6fd   : > { %v2758_v12 = vpop.xlane.xlu0 %2757 }
 0x6fe   : > { %v2778_v35 = vsub.f32 %v5458_v43, %v2758_v12 }
 0x700   : > { %v2787_v61 = vmul.f32 1.442695, %v2778_v35 }
 0x701   : > { %v2761_v17 = vpop.xlane.xlu0 %2760 }
 0x702   : > { %4532 = vpow2.f32 %v2787_v61  ;;  %v2779_v19 = vsub.f32 %v5460_v38, %v2761_v17 }
 0x704   : > { %v2789_v3 = vmul.f32 1.442695, %v2779_v19 }
 0x705   : > { %v2767_v59 = vpop.xlane.xlu0 %2766 }
 0x706   : > { %4534 = vpow2.f32 %v2789_v3  ;;  %v2755_v6 = vpop.xlane.xlu1 %2754  ;;  %v2781_v43 = vsub.f32 %v5464_v0, %v2767_v59 }
 0x707   : > { %v2777_v2 = vsub.f32 %v5468_v13, %v2755_v6 }
 0x708   : > { %v2793_v60 = vmul.f32 1.442695, %v2781_v43 }
 0x709   : > { %v2785_v48 = vmul.f32 1.442695, %v2777_v2  ;;  %v2773_v22 = vpop.xlane.xlu0 %2772 }
 0x70a   : > { %v2783_v50 = vsub.f32 %v5470_v44, %v2773_v22  ;;  %v2764_v27 = vpop.xlane.xlu1 %2763 }
 0x70b   : > { %4536 = vpow2.f32 %v2785_v48  ;;  %v2780_v29 = vsub.f32 %v5474_v23, %v2764_v27 }
 0x70c   : > { %v2797_v9 = vmul.f32 1.442695, %v2783_v50 }
 0x70d   : > { %v2791_v39 = vmul.f32 1.442695, %v2780_v29  ;;  %v3097_v11 = vpop.xlane.xlu0 %3096 }
 0x70e   : > { %v2770_v38 = vpop.xlane.xlu1 %2769 }
 0x70f   : > { %v5545_v57 = vpop.eup %4532  ;;  %4538 = vpow2.f32 %v2791_v39  ;;  %v2782_v58 = vsub.f32 %v5482_v45, %v2770_v38  ;;  %v3119_v45 = vsub.f32 %v5478_v31, %v3097_v11 }
 0x710   : > { %v2804_v13 = vsel %vm903_vm3, %v5545_v57, 0.0  ;;  %4540 = vpow2.f32 %v2797_v9 }
 0x711   : > { %v2795_v44 = vmul.f32 1.442695, %v2782_v58  ;;  %2805 = vadd.xlane.f32.xlu1 %v2804_v13  ;;  %v3103_v33 = vpop.xlane.xlu0 %3102  ;;  %v3127_v41 = vmul.f32 1.442695, %v3119_v45 }
 0x712   : > { %v2776_v23 = vpop.xlane.xlu1 %2775  ;;  %v3121_v7 = vsub.f32 %v5486_v52, %v3103_v33 }
 0x713   : > { %v5550_v24 = vpop.eup %4534  ;;  %4542 = vpow2.f32 %v2795_v44  ;;  %v2784_v0 = vsub.f32 %v5490_v15, %v2776_v23 }
 0x714   : > { %v2807_v26 = vsel %vm903_vm3, %v5550_v24, 0.0  ;;  %4544 = vpow2.f32 %v2793_v60  ;;  %v3131_v16 = vmul.f32 1.442695, %v3121_v7 }
 0x715   : > { %v2799_v51 = vmul.f32 1.442695, %v2784_v0  ;;  %2808 = vadd.xlane.f32.xlu1 %v2807_v26  ;;  %v3109_v54 = vpop.xlane.xlu0 %3108 }
 0x716   : > { %v3100_v55 = vpop.xlane.xlu1 %3099 }
 0x717   : > { %v3120_v1 = vsub.f32 %v5498_v63, %v3100_v55  ;;  %4546 = vpow2.f32 %v2799_v51  ;;  %v3123_v63 = vsub.f32 %v5494_v62, %v3109_v54 }
 0x718   : > { %v5557_v5 = vpop.eup %4536 }
 0x719   : > { %v3129_v8 = vmul.f32 1.442695, %v3120_v1  ;;  %v3115_v15 = vpop.xlane.xlu0 %3114  ;;  %v2801_v21 = vsel %vm903_vm3, %v5557_v5, 0.0  ;;  %v3135_v35 = vmul.f32 1.442695, %v3123_v63 }
 0x71a   : > { %v3106_v10 = vpop.xlane.xlu1 %3105  ;;  %2802 = vadd.xlane.f32.xlu0 %v2801_v21 }
 0x71b   : > { %4548 = vpow2.f32 %v3129_v8  ;;  %v3122_v31 = vsub.f32 %v5506_v53, %v3106_v10 }
 0x71c   : > { %v5563_v18 = vpop.eup %4538  ;;  %4550 = vpow2.f32 %v3127_v41 }
 0x71d   : > { %v3133_v40 = vmul.f32 1.442695, %v3122_v31  ;;  %v2433_v52 = vpop.permute.xlu0 %2432  ;;  %v2810_v14 = vsel %vm903_vm3, %v5563_v18, 0.0  ;;  %v5568_v20 = vpop.eup %4540 }
 0x71e   : > { %2450 = vst.msk [vmem:[#allocation2 + $0x30] sm:$0xff] %vm1531_vm4, %v2433_v52  ;;  %v3112_v25 = vpop.xlane.xlu1 %3111  ;;  %2811 = vadd.xlane.f32.xlu0 %v2810_v14  ;;  %v2819_v17 = vsel %vm903_vm3, %v5568_v20, 0.0 }
 0x71f   : > { %4552 = vpow2.f32 %v3133_v40  ;;  %v3124_v53 = vsub.f32 %v5512_v56, %v3112_v25  ;;  %v3125_v56 = vsub.f32 %v5502_v28, %v3115_v15 }
 0x720   : > { %v5572_v12 = vpop.eup %4542  ;;  %4554 = vpow2.f32 %v3131_v16 }
 0x721   : > { %v3137_v61 = vmul.f32 1.442695, %v3124_v53  ;;  %v2816_v62 = vsel %vm903_vm3, %v5572_v12, 0.0  ;;  %v5578_v19 = vpop.eup %4544  ;;  %v3139_v27 = vmul.f32 1.442695, %v3125_v56 }
 0x722   : > { %2817 = vadd.xlane.f32.xlu1 %v2816_v62  ;;  %v3118_v3 = vpop.xlane.xlu1 %3117  ;;  %2820 = vadd.xlane.f32.xlu0 %v2819_v17  ;;  %v2813_v2 = vsel %vm903_vm3, %v5578_v19, 0.0 }
 0x723   : > { %4556 = vpow2.f32 %v3137_v61  ;;  %v3126_v59 = vsub.f32 %v5516_v4, %v3118_v3 }
 0x724   : > { %4558 = vpow2.f32 %v3135_v35  ;;  %v5584_v48 = vpop.eup %4546 }
 0x725   : > { %v3141_v6 = vmul.f32 1.442695, %v3126_v59  ;;  %v2822_v4 = vsel %vm903_vm3, %v5584_v48, 0.0  ;;  %v2458_v13 = vld [vmem:[#allocation2 + $0x30] sm:$0xff] }
 0x726   : > { %2814 = vadd.xlane.f32.xlu1 %v2813_v2  ;;  %v2431_v22 = vpop.permute.xlu1 %2430 }
 0x727   : > { %2449 = vst.msk [vmem:[#allocation2 + $0x28] sm:$0xff] %vm1531_vm4, %v2431_v22  ;;  %4560 = vpow2.f32 %v3141_v6 }
 0x728   : > { %v5587_v50 = vpop.eup %4548  ;;  %4562 = vpow2.f32 %v3139_v27 }
 0x729   : > { %v3146_v28 = vsel %vm903_vm3, %v5587_v50, 0.0  ;;  %v5593_v29 = vpop.eup %4550 }
 0x72a   : > { %2823 = vadd.xlane.f32.xlu1 %v2822_v4  ;;  %v2435_v43 = vpop.permute.xlu1 %2434  ;;  %3147 = vadd.xlane.f32.xlu0 %v3146_v28  ;;  %v3143_v38 = vsel %vm903_vm3, %v5593_v29, 0.0 }
 0x72b   : > { %2451 = vst.msk [vmem:[#allocation2 + $0x38] sm:$0xff] %vm1531_vm4, %v2435_v43 }
 0x72c   : > { %v5596_v9 = vpop.eup %4552 }
 0x72d   : > { %v5598_v39 = vpop.eup %4554  ;;  %v3152_v11 = vsel %vm903_vm3, %v5596_v9, 0.0 }
 0x72e   : > { %3153 = vadd.xlane.f32.xlu0 %v3152_v11  ;;  %3144 = vadd.xlane.f32.xlu1 %v3143_v38  ;;  %v2457_v58 = vld [vmem:[#allocation2 + $0x28] sm:$0xff]  ;;  %v3149_v33 = vsel %vm903_vm3, %v5598_v39, 0.0 }
 0x72f   : > { %4283 = vmatmul.mubr.msk.f32.gmra.mxu1 %vm460_vm0, %v2457_v58 }
 0x730   : > { %v5605_v60 = vpop.eup %4556  ;;  %4285 = vmatprep.mubr.msk.f32.mxu1 %vm460_vm0, %v2458_v13 }
 0x731   : > { %v3158_v44 = vsel %vm903_vm3, %v5605_v60, 0.0  ;;  %v5612_v23 = vpop.eup %4558 }
 0x732   : > { %3159 = vadd.xlane.f32.xlu0 %v3158_v44  ;;  %3150 = vadd.xlane.f32.xlu1 %v3149_v33  ;;  %v2459_v0 = vld [vmem:[#allocation2 + $0x38] sm:$0xff]  ;;  %v3155_v26 = vsel %vm903_vm3, %v5612_v23, 0.0 }
 0x733   : > { %4286 = vmatmul.mubr.msk.f32.gmra.mxu1 %vm460_vm0, %v2459_v0 }
 0x734   : > { %v5617_v45 = vpop.eup %4560 }
 0x735   : > { %v3164_v51 = vsel %vm903_vm3, %v5617_v45, 0.0  ;;  %v5621_v54 = vpop.eup %4562 }
 0x736   : > { %3156 = vadd.xlane.f32.xlu0 %v3155_v26  ;;  %v3161_v55 = vsel %vm903_vm3, %v5621_v54, 0.0 }
 0x73a   : > { %3165 = vadd.xlane.f32.xlu0 %v3164_v51 }
 0x73e   : > { %3162 = vadd.xlane.f32.xlu0 %v3161_v55 }
 0x754   : > { %3184 = vrot.lane.b32.xlu0 %v4859_v42, %s4634_s28 }
 0x79a   : > { %v2806_v1 = vpop.xlane.xlu1 %2805 }
 0x79b   : > { %4564 = vrcp.f32 %v2806_v1 }
 0x79e   : > { %v2809_v7 = vpop.xlane.xlu1 %2808 }
 0x79f   : > { %4566 = vrcp.f32 %v2809_v7 }
 0x7a3   : > { %v2803_v41 = vpop.xlane.xlu0 %2802 }
 0x7a4   : > { %4568 = vrcp.f32 %v2803_v41 }
 0x7a7   : > { %v2812_v8 = vpop.xlane.xlu0 %2811 }
 0x7a8   : > { %4570 = vrcp.f32 %v2812_v8  ;;  %v4565_v10 = vpop.eup %4564 }
 0x7a9   : > { %v2834_v42 = vmul.f32 %v4565_v10, %v5545_v57 }
 0x7ab   : > { %v2818_v15 = vpop.xlane.xlu1 %2817  ;;  %v2821_v21 = vpop.xlane.xlu0 %2820 }
 0x7ac   : > { %4572 = vrcp.f32 %v2818_v15  ;;  %v4567_v16 = vpop.eup %4566 }
 0x7ad   : > { %4574 = vrcp.f32 %v2821_v21  ;;  %v2835_v25 = vmul.f32 %v4567_v16, %v5550_v24 }
 0x7af   : > { %v2815_v31 = vpop.xlane.xlu1 %2814 }
 0x7b0   : > { %4576 = vrcp.f32 %v2815_v31 }
 0x7b1   : > { %v4569_v63 = vpop.eup %4568 }
 0x7b2   : > { %v2833_v40 = vmul.f32 %v4569_v63, %v5557_v5 }
 0x7b3   : > { %v2824_v52 = vpop.xlane.xlu1 %2823  ;;  %v3148_v14 = vpop.xlane.xlu0 %3147 }
 0x7b4   : > { %4578 = vrcp.f32 %v2824_v52  ;;  %4304 = vmatprep.mubr.msk.f32.mxu1 %vm903_vm3, %v2833_v40 }
 0x7b5   : > { %v4571_v53 = vpop.eup %4570  ;;  %4305 = vmatmul.mubr.msk.f32.vlgmr.msra.gmra.mxu1 %vm903_vm3, %v2834_v42 }
 0x7b6   : > { %4307 = vmatprep.mubr.msk.f32.mxu1 %vm903_vm3, %v2835_v25  ;;  %v2836_v35 = vmul.f32 %v4571_v53, %v5563_v18 }
 0x7b7   : > { %v3145_v61 = vpop.xlane.xlu1 %3144  ;;  %v3154_v62 = vpop.xlane.xlu0 %3153 }
 0x7b8   : > { %4580 = vrcp.f32 %v3145_v61 }
 0x7b9   : > { %4308 = vmatmul.mubr.msk.f32.gmra.mxu1 %vm903_vm3, %v2836_v35  ;;  %v4573_v57 = vpop.eup %4572  ;;  %4582 = vrcp.f32 %v3148_v14 }
 0x7ba   : > { %v4575_v3 = vpop.eup %4574  ;;  %v2838_v6 = vmul.f32 %v4573_v57, %v5572_v12 }
 0x7bb   : > { %v3151_v5 = vpop.xlane.xlu1 %3150  ;;  %v3160_v17 = vpop.xlane.xlu0 %3159  ;;  %v2839_v18 = vmul.f32 %v4575_v3, %v5568_v20  ;;  %v5703_v3 = vld [vmem:[%s416_s16 + $0x18] sm:$0xff] }
 0x7bc   : > { %4584 = vrcp.f32 %v3151_v5  ;;  %v5699_v5 = vld [vmem:[%s416_s16 + $0x10] sm:$0xff] }
 0x7bd   : > { %v4577_v59 = vpop.eup %4576  ;;  %4586 = vrcp.f32 %v3154_v62  ;;  %v5695_v62 = vld [vmem:[%s416_s16] sm:$0xff] }
 0x7be   : > { %v2837_v24 = vmul.f32 %v4577_v59, %v5578_v19  ;;  %v3542_v57 = vsel %vm3541_vm5, %v5695_v62, 0.0  ;;  %v437_v59 = vld [vmem:[%s416_s16 + $0x8] sm:$0xff] }
 0x7bf   : > { %v3157_v56 = vpop.xlane.xlu0 %3156 }
 0x7c0   : > { %4310 = vmatprep.mubr.msk.f32.mxu1 %vm903_vm3, %v2837_v24  ;;  %4588 = vrcp.f32 %v3157_v56  ;;  %v3551_v24 = vsel %vm3541_vm5, %v5703_v3, 0.0  ;;  %v3545_v56 = vsel %vm3541_vm5, %v437_v59, 0.0 }
 0x7c1   : > { %v4579_v2 = vpop.eup %4578  ;;  %4311 = vmatmul.mubr.msk.f32.gmra.mxu1 %vm903_vm3, %v2838_v6  ;;  %4590 = vrcp.f32 %v3160_v17  ;;  %v3548_v17 = vsel %vm3541_vm5, %v5699_v5, 0.0  ;;  %v5708_v6 = vld [vmem:[%s416_s16 + $0x28] sm:$0xff] }
 0x7c2   : > { %4313 = vmatprep.mubr.msk.f32.mxu1 %vm903_vm3, %v2839_v18  ;;  %v2840_v22 = vmul.f32 %v4579_v2, %v5584_v48  ;;  %v440_v18 = vld [vmem:[%s416_s16 + $0x20] sm:$0xff]  ;;  %v3557_v2 = vsel %vm3541_vm5, %v5708_v6, 0.0 }
 0x7c3   : > { %v3166_v27 = vpop.xlane.xlu0 %3165 }
 0x7c4   : > { %4592 = vrcp.f32 %v3166_v27  ;;  %v5713_v27 = vld [vmem:[%s416_s16 + $0x38] sm:$0xff] }
 0x7c5   : > { %v4581_v4 = vpop.eup %4580  ;;  %4314 = vmatmul.mubr.msk.f32.gmra.mxu1 %vm903_vm3, %v2840_v22  ;;  %v3554_v22 = vsel %vm3541_vm5, %v440_v18, 0.0 }
 0x7c6   : > { %v3175_v12 = vmul.f32 %v4581_v4, %v5593_v29  ;;  %v4583_v20 = vpop.eup %4582  ;;  %v442_v4 = vld [vmem:[%s416_s16 + $0x30] sm:$0xff] }
 0x7c7   : > { %v3163_v19 = vpop.xlane.xlu0 %3162  ;;  %v3176_v11 = vmul.f32 %v4583_v20, %v5587_v50  ;;  %v4637_v20 = vmov 1  }
 0x7c8   : > { %4594 = vrcp.f32 %v3163_v19  ;;  %4332 = vmatprep.mubr.msk.f32.mxu1 %vm903_vm3, %v3175_v12  ;;  %v3563_v12 = vsel %vm3541_vm5, %v5713_v27, 0.0  ;;  %v3560_v19 = vsel %vm3541_vm5, %v442_v4, 0.0 }
 0x7c9   : > { %v4585_v28 = vpop.eup %4584 }
 0x7ca   : > { %v4587_v38 = vpop.eup %4586  ;;  %v3177_v48 = vmul.f32 %v4585_v28, %v5598_v39  ;;  %v4638_v28 = vmov 2  }
 0x7cb   : > { %v3185_v43 = vpop.permute.xlu0 %3184  ;;  %v3178_v29 = vmul.f32 %v4587_v38, %v5596_v9  ;;  %v4636_v9 = vmov 0  }
 0x7cc   : > { %4330 = vmatprep.subr.mxu1 %v3185_v43  ;;  %4398 = vset.pattern.permute.xlu1 %v4636_v9 }
 0x7cd   : > { %4331 = vmatpush3.msra.mxu1 %v3185_v43  ;;  %v4589_v58 = vpop.eup %4588  ;;  %4399 = vset.pattern.permute.xlu0 %v4636_v9 }
 0x7ce   : > { %4333 = vmatmul.mubr.msk.f32.vlgmr.msra.gmra.mxu1 %vm903_vm3, %v3176_v11  ;;  %v4591_v13 = vpop.eup %4590  ;;  %v3179_v44 = vmul.f32 %v4589_v58, %v5612_v23  ;;  %v5659_v23 = vpop.f32.mrf.mxu1 }
 0x7cf   : > { %4335 = vmatprep.mubr.msk.f32.mxu1 %vm903_vm3, %v3177_v48  ;;  %v3180_v33 = vmul.f32 %v4591_v13, %v5605_v60 }
 0x7d0   : > { %v5661_v51 = vpop.f32.mrf.mxu1 }
 0x7d1   : > { %v4593_v50 = vpop.eup %4592 }
 0x7d2   : > { %4336 = vmatmul.mubr.msk.f32.gmra.mxu1 %vm903_vm3, %v3178_v29  ;;  %v3182_v26 = vmul.f32 %v4593_v50, %v5617_v45  ;;  %v5663_v55 = vpop.f32.mrf.mxu1 }
 0x7d3   : > { %4338 = vmatprep.mubr.msk.f32.mxu1 %vm903_vm3, %v3179_v44 }
 0x7d4   : > { %v5665_v60 = vpop.f32.mrf.mxu1 }
 0x7d5   : > { %v4595_v0 = vpop.eup %4594 }
 0x7d6   : > { %4339 = vmatmul.mubr.msk.f32.gmra.mxu1 %vm903_vm3, %v3180_v33  ;;  %v3181_v39 = vmul.f32 %v4595_v0, %v5621_v54 }
 0x7d8   : > { %4341 = vmatprep.mubr.msk.f32.mxu1 %vm903_vm3, %v3181_v39 }
 0x7da   : > { %4342 = vmatmul.mubr.msk.f32.gmra.mxu1 %vm903_vm3, %v3182_v26 }
 0x7ef   : > { %v5667_v1 = vpop.f32.mrf.mxu1 }
 0x7f1   : > { %v5669_v54 = vpop.f32.mrf.mxu1 }
 0x7f3   : > { %v5671_v7 = vpop.f32.mrf.mxu1 }
 0x7f5   : > { %v5673_v45 = vpop.f32.mrf.mxu1 }
 0x875   : > { %v4306_v41 = vpop.f32.mrf.mxu1 }
 0x876   : > { %2971 = vst.msk [vmem:[#allocation2 + $0x8] sm:$0xff] %vm762_vm2, %v4306_v41 }
 0x877   : > { %v2931_v8 = vpop.f32.mrf.mxu1 }
 0x878   : > { %2970 = vst.msk [vmem:[#allocation2] sm:$0xff] %vm762_vm2, %v2931_v8 }
 0x879   : > { %v4309_v15 = vpop.f32.mrf.mxu1 }
 0x87a   : > { %2973 = vst.msk [vmem:[#allocation2 + $0x18] sm:$0xff] %vm762_vm2, %v4309_v15 }
 0x87b   : > { %v2941_v21 = vpop.f32.mrf.mxu1 }
 0x87c   : > { %2972 = vst.msk [vmem:[#allocation2 + $0x10] sm:$0xff] %vm762_vm2, %v2941_v21 }
 0x881   : > { %v4312_v10 = vpop.f32.mrf.mxu1 }
 0x882   : > { %2975 = vst.msk [vmem:[#allocation2 + $0x28] sm:$0xff] %vm762_vm2, %v4312_v10 }
 0x883   : > { %v2951_v31 = vpop.f32.mrf.mxu1 }
 0x884   : > { %2974 = vst.msk [vmem:[#allocation2 + $0x20] sm:$0xff] %vm762_vm2, %v2951_v31 }
 0x885   : > { %v4315_v16 = vpop.f32.mrf.mxu1 }
 0x886   : > { %2977 = vst.msk [vmem:[#allocation2 + $0x38] sm:$0xff] %vm762_vm2, %v4315_v16 }
 0x887   : > { %v2961_v63 = vpop.f32.mrf.mxu1 }
 0x888   : > { %2976 = vst.msk [vmem:[#allocation2 + $0x30] sm:$0xff] %vm762_vm2, %v2961_v63 }
 0x88e   : > { %v4334_v40 = vpop.f32.mrf.mxu1 }
 0x890   : > { %v3277_v42 = vpop.f32.mrf.mxu1 }
 0x891   : > { %3324 = vrot.lane.b32.xlu1 %v3277_v42, %s4635_s20 }
 0x892   : > { %v4337_v52 = vpop.f32.mrf.mxu1 }
 0x894   : > { %v3287_v14 = vpop.f32.mrf.mxu1 }
 0x895   : > { %3326 = vrot.lane.b32.xlu1 %v4334_v40, %s4635_s20  ;;  %3328 = vrot.lane.b32.xlu0 %v3287_v14, %s4635_s20 }
 0x896   : > { %v4340_v25 = vpop.f32.mrf.mxu1 }
 0x898   : > { %v3297_v53 = vpop.f32.mrf.mxu1 }
 0x899   : > { %3330 = vrot.lane.b32.xlu1 %v4337_v52, %s4635_s20  ;;  %3332 = vrot.lane.b32.xlu0 %v3297_v53, %s4635_s20 }
 0x89a   : > { %v4343_v35 = vpop.f32.mrf.mxu1 }
 0x89c   : > { %v3307_v61 = vpop.f32.mrf.mxu1 }
 0x89d   : > { %3334 = vrot.lane.b32.xlu1 %v4340_v25, %s4635_s20  ;;  %3336 = vrot.lane.b32.xlu0 %v3307_v61, %s4635_s20 }
 0x8a1   : > { %3338 = vrot.lane.b32.xlu1 %v4343_v35, %s4635_s20 }
 0x8bc   : > { %3543 = vadd.xlane.f32.xlu0 %v3542_v57 }
 0x8c0   : > { %3549 = vadd.xlane.f32.xlu0 %v3548_v17 }
 0x8c4   : > { %3552 = vadd.xlane.f32.xlu0 %v3551_v24 }
 0x8c5   : > { %3546 = vadd.xlane.f32.xlu1 %v3545_v56 }
 0x8c8   : > { %3558 = vadd.xlane.f32.xlu0 %v3557_v2 }
 0x8c9   : > { %3555 = vadd.xlane.f32.xlu1 %v3554_v22 }
 0x8cc   : > { %3564 = vadd.xlane.f32.xlu0 %v3563_v12  ;;  %v5766_v12 = vld [vmem:[%s5873_s7] ss:$0 sm:$0xff] }
 0x8cd   : > { %3561 = vadd.xlane.f32.xlu1 %v3560_v19 }
 0x8de   : > { %1679 = vperm.xlu1 %4398, %v5695_v62  }
 0x8e2   : > { %1689 = vperm.xlu1 %4398, %v5699_v5   ;;  %1684 = vperm.xlu0 %4399, %v437_v59  }
 0x8e6   : > { %1694 = vperm.xlu1 %4398, %v5703_v3   ;;  %4401 = vset.pattern.permute.xlu0 %v4637_v20 }
 0x8e7   : > { %2598 = vperm.xlu0 %4401, %v5699_v5  }
 0x8ea   : > { %1699 = vperm.xlu1 %4398, %v440_v18  }
 0x8eb   : > { %2610 = vperm.xlu0 %4401, %v5708_v6  }
 0x8ee   : > { %1704 = vperm.xlu1 %4398, %v5708_v6  }
 0x8ef   : > { %2618 = vperm.xlu0 %4401, %v5713_v27  }
 0x8f2   : > { %1709 = vperm.xlu1 %4398, %v442_v4  }
 0x8f3   : > { %4403 = vset.pattern.permute.xlu0 %v4638_v28 }
 0x8f4   : > { %3498 = vperm.xlu0 %4403, %v437_v59  }
 0x8f6   : > { %1714 = vperm.xlu1 %4398, %v5713_v27  }
 0x8f8   : > { %3510 = vperm.xlu0 %4403, %v440_v18  }
 0x8fa   : > { %4400 = vset.pattern.permute.xlu1 %v4637_v20  ;;  %v5772_v20 = vld [vmem:[%s5874_s8] ss:$0 sm:$0xff] }
 0x8fb   : > { %2590 = vperm.xlu1 %4400, %v5695_v62  }
 0x8fc   : > { %3518 = vperm.xlu0 %4403, %v442_v4  }
 0x8ff   : > { %2594 = vperm.xlu1 %4400, %v437_v59  }
 0x903   : > { %v3325_v43 = vpop.permute.xlu1 %3324  ;;  %2602 = vperm.xlu1 %4400, %v5703_v3  }
 0x904   : > { %3348 = vst.msk [vmem:[#allocation2] sm:$0xff] %vm1531_vm4, %v3325_v43 }
 0x907   : > { %v3327_v11 = vpop.permute.xlu1 %3326  ;;  %v3329_v38 = vpop.permute.xlu0 %3328  ;;  %2606 = vperm.xlu1 %4400, %v440_v18  }
 0x908   : > { %3349 = vst.msk [vmem:[#allocation2 + $0x8] sm:$0xff] %vm1531_vm4, %v3327_v11  ;;  %3350 = vst.msk [vmem:[#allocation2 + $0x10] sm:$0xff] %vm1531_vm4, %v3329_v38 }
 0x90b   : > { %v3331_v48 = vpop.permute.xlu1 %3330  ;;  %v3333_v58 = vpop.permute.xlu0 %3332  ;;  %2614 = vperm.xlu1 %4400, %v442_v4   ;;  %v3356_v29 = vld [vmem:[#allocation2] sm:$0xff] }
 0x90c   : > { %3351 = vst.msk [vmem:[#allocation2 + $0x18] sm:$0xff] %vm1531_vm4, %v3331_v48  ;;  %3352 = vst.msk [vmem:[#allocation2 + $0x20] sm:$0xff] %vm1531_vm4, %v3333_v58  ;;  %4352 = vmatprep.mubr.msk.f32.mxu0 %vm460_vm0, %v3356_v29 }
 0x90f   : > { %v3335_v13 = vpop.permute.xlu1 %3334  ;;  %v3337_v44 = vpop.permute.xlu0 %3336  ;;  %v3357_v50 = vld [vmem:[#allocation2 + $0x8] sm:$0xff]  ;;  %v3358_v33 = vld [vmem:[#allocation2 + $0x10] sm:$0xff]  ;;  %4402 = vset.pattern.permute.xlu1 %v4638_v28 }
 0x910   : > { %3353 = vst.msk [vmem:[#allocation2 + $0x28] sm:$0xff] %vm1531_vm4, %v3335_v13  ;;  %3354 = vst.msk [vmem:[#allocation2 + $0x30] sm:$0xff] %vm1531_vm4, %v3337_v44  ;;  %4353 = vmatmul.mubr.msk.f32.vlgmr.msra.gmra.mxu0 %vm460_vm0, %v3357_v50  ;;  %3494 = vperm.xlu1 %4402, %v5695_v62  }
 0x911   : > { %4355 = vmatprep.mubr.msk.f32.mxu0 %vm460_vm0, %v3358_v33 }
 0x913   : > { %v3339_v0 = vpop.permute.xlu1 %3338  ;;  %v3359_v39 = vld [vmem:[#allocation2 + $0x18] sm:$0xff]  ;;  %v3360_v26 = vld [vmem:[#allocation2 + $0x20] sm:$0xff] }
 0x914   : > { %3355 = vst.msk [vmem:[#allocation2 + $0x38] sm:$0xff] %vm1531_vm4, %v3339_v0  ;;  %4356 = vmatmul.mubr.msk.f32.gmra.mxu0 %vm460_vm0, %v3359_v39  ;;  %3502 = vperm.xlu1 %4402, %v5699_v5  }
 0x915   : > { %4358 = vmatprep.mubr.msk.f32.mxu0 %vm460_vm0, %v3360_v26 }
 0x917   : > { %v3361_v9 = vld [vmem:[#allocation2 + $0x28] sm:$0xff]  ;;  %v3362_v41 = vld [vmem:[#allocation2 + $0x30] sm:$0xff] }
 0x918   : > { %4359 = vmatmul.mubr.msk.f32.gmra.mxu0 %vm460_vm0, %v3361_v9  ;;  %3506 = vperm.xlu1 %4402, %v5703_v3  }
 0x919   : > { %4361 = vmatprep.mubr.msk.f32.mxu0 %vm460_vm0, %v3362_v41 }
 0x91b   : > { %v3363_v8 = vld [vmem:[#allocation2 + $0x38] sm:$0xff] }
 0x91c   : > { %4362 = vmatmul.mubr.msk.f32.gmra.mxu0 %vm460_vm0, %v3363_v8  ;;  %3514 = vperm.xlu1 %4402, %v5708_v6  }
 0x920   : > { %3522 = vperm.xlu1 %4402, %v5713_v27  }
 0x945   : > { %v3544_v52 = vpop.xlane.xlu0 %3543 }
 0x946   : > { %v3589_v22 = vsub.f32 1.0, %v3544_v52  ;;  %v3573_v28 = vmul.f32 %v5766_v12, %v3544_v52 }
 0x948   : > { %v3604_v38 = vmul.f32 %v5772_v20, %v3589_v22 }
 0x949   : > { %v3550_v25 = vpop.xlane.xlu0 %3549 }
 0x94a   : > { %v3591_v4 = vsub.f32 1.0, %v3550_v25  ;;  %v5777_v48 = vmul.f32 %v5766_v12, %v3550_v25 }
 0x94d   : > { %v3553_v35 = vpop.xlane.xlu0 %3552 }
 0x94e   : > { %v3547_v15 = vpop.xlane.xlu1 %3546  ;;  %v3592_v11 = vsub.f32 1.0, %v3553_v35  ;;  %v3576_v50 = vmul.f32 %v5766_v12, %v3553_v35 }
 0x94f   : > { %v3590_v43 = vsub.f32 1.0, %v3547_v15  ;;  %v3574_v44 = vmul.f32 %v5766_v12, %v3547_v15 }
 0x951   : > { %v3559_v62 = vpop.xlane.xlu0 %3558 }
 0x952   : > { %v5749_v21 = vpop.xlane.xlu1 %3555  ;;  %v3594_v33 = vsub.f32 1.0, %v3559_v62 }
 0x953   : > { %v3593_v52 = vsub.f32 1.0, %v5749_v21 }
 0x955   : > { %v5759_v5 = vpop.xlane.xlu0 %3564 }
 0x956   : > { %v5751_v10 = vpop.xlane.xlu1 %3561 }
 0x95a   : > { %v1680_v31 = vpop.permute.xlu1 %1679 }
 0x95b   : > { %v1717_v26 = vmul.f32 %v1680_v31, %v5425_v32  ;;  %v5795_v32 = vmul.f32 %v5766_v12, %v5749_v21  ;;  %v5799_v31 = vmul.f32 %v5772_v20, %v3594_v33 }
 0x95d   : > { %v1685_v3 = vpop.permute.xlu0 %1684 }
 0x95e   : > { %v1690_v16 = vpop.permute.xlu1 %1689  ;;  %v1718_v58 = vmul.f32 %v5423_v30, %v1685_v3  ;;  %v3605_v30 = vmul.f32 %v5772_v20, %v3590_v43 }
 0x962   : > { %v1695_v63 = vpop.permute.xlu1 %1694  ;;  %v2599_v24 = vpop.permute.xlu0 %2598 }
 0x963   : > { %v2623_v25 = vmul.f32 %v2599_v24, %v5665_v60  ;;  %v1720_v35 = vmul.f32 %v5427_v34, %v1695_v63  ;;  %v3608_v63 = vmul.f32 %v5772_v20, %v3593_v52 }
 0x966   : > { %v5753_v40 = vpop.permute.xlu1 %1699  ;;  %v2611_v18 = vpop.permute.xlu0 %2610 }
 0x96a   : > { %v1705_v42 = vpop.permute.xlu1 %1704  ;;  %v2619_v27 = vpop.permute.xlu0 %2618 }
 0x96b   : > { %v1722_v21 = vmul.f32 %v5431_v37, %v1705_v42  ;;  %v2628_v37 = vmul.f32 %v5671_v7, %v2619_v27  ;;  %v4601_v7 = vld [vmem:[%s4737_s14] sm:$0xff] }
 0x96e   : > { %v5755_v14 = vpop.permute.xlu1 %1709 }
 0x96f   : > { %v3499_v13 = vpop.permute.xlu0 %3498 }
 0x972   : > { %v5757_v53 = vpop.permute.xlu1 %1714 }
 0x976   : > { %v2591_v61 = vpop.permute.xlu1 %2590 }
 0x977   : > { %v2621_v29 = vmul.f32 %v2591_v61, %v5661_v51  ;;  %v3607_v51 = vmul.f32 %v5772_v20, %v3592_v11 }
 0x979   : > { %v2629_v61 = vadd.f32 %v2621_v29, %v1717_v26 }
 0x97a   : > { %v2595_v57 = vpop.permute.xlu1 %2594 }
 0x97b   : > { %v2622_v19 = vmul.f32 %v5659_v23, %v2595_v57  ;;  %v5782_v23 = vmul.f32 %v5772_v20, %v3591_v4 }
 0x97d   : > { %v2630_v9 = vadd.f32 %v2622_v19, %v1718_v58 }
 0x97e   : > { %v2603_v17 = vpop.permute.xlu1 %2602 }
 0x97f   : > { %v2624_v41 = vmul.f32 %v5663_v55, %v2603_v17  ;;  %v3578_v55 = vmul.f32 %v5766_v12, %v3559_v62  ;;  %v1719_v17 = vmul.f32 %v1690_v16, %v5429_v36  ;;  %v1721_v16 = vmul.f32 %v5753_v40, %v5433_v46 }
 0x981   : > { %v2632_v60 = vadd.f32 %v2624_v41, %v1720_v35 }
 0x982   : > { %v2607_v59 = vpop.permute.xlu1 %2606 }
 0x983   : > { %v2625_v19 = vmul.f32 %v2607_v59, %v5669_v54  ;;  %v1724_v54 = vmul.f32 %v5435_v47, %v5757_v53  ;;  %v3511_v59 = vpop.permute.xlu0 %3510 }
 0x985   : > { %v2633_v26 = vadd.f32 %v2625_v19, %v1721_v16  ;;  %v4605_v19 = vld [vmem:[%s4737_s14 + $0x20] sm:$0xff] }
 0x986   : > { %v5761_v56 = vpop.permute.xlu1 %2614 }
 0x987   : > { %v2627_v46 = vmul.f32 %v5761_v56, %v5673_v45 }
 0x98b   : > { %v3495_v6 = vpop.permute.xlu1 %3494 }
 0x98f   : > { %v3503_v2 = vpop.permute.xlu1 %3502 }
 0x993   : > { %v3507_v39 = vpop.permute.xlu1 %3506 }
 0x997   : > { %v3515_v43 = vpop.permute.xlu1 %3514 }
 0x99b   : > { %v3523_v45 = vpop.permute.xlu1 %3522 }
 0x9d0   : > { %v4354_v0 = vpop.f32.mrf.mxu0 }
 0x9d1   : > { %v3526_v8 = vmul.f32 %v4354_v0, %v3499_v13  ;;  %v2626_v13 = vmul.f32 %v5667_v1, %v2611_v18 }
 0x9d2   : > { %v3454_v15 = vpop.f32.mrf.mxu0 }
 0x9d3   : > { %v3534_v57 = vadd.f32 %v3526_v8, %v2630_v9  ;;  %v3525_v3 = vmul.f32 %v3495_v6, %v3454_v15  ;;  %v2631_v6 = vadd.f32 %v2623_v25, %v1719_v17  ;;  %v2636_v9 = vadd.f32 %v2628_v37, %v1724_v54  ;;  %v4602_v8 = vld [vmem:[%s4737_s14 + $0x18] sm:$0xff] }
 0x9d4   : > { %v4357_v22 = vpop.f32.mrf.mxu0  ;;  %v3595_v25 = vsub.f32 1.0, %v5751_v10 }
 0x9d5   : > { %v3582_v24 = vadd.f32 %v3574_v44, %v3534_v57  ;;  %v3533_v4 = vadd.f32 %v3525_v3, %v2629_v61  ;;  %v3528_v34 = vmul.f32 %v4357_v22, %v3507_v39  ;;  %v2634_v39 = vadd.f32 %v2626_v13, %v1722_v21  ;;  %v3519_v61 = vpop.permute.xlu0 %3518  ;;  %v4603_v57 = vld [vmem:[%s4737_s14 + $0x10] sm:$0xff] }
 0x9d6   : > { %v3464_v62 = vpop.f32.mrf.mxu0  ;;  %v3610_v21 = vmul.f32 %v5772_v20, %v3595_v25 }
 0x9d7   : > { %v3613_v11 = vadd.f32 %v3605_v30, %v3582_v24  ;;  %v3581_v58 = vadd.f32 %v3573_v28, %v3533_v4  ;;  %v3536_v29 = vadd.f32 %v3528_v34, %v2632_v60  ;;  %v3527_v36 = vmul.f32 %v3503_v2, %v3464_v62  ;;  %v4600_v2 = vld [vmem:[%s4737_s14 + $0x8] sm:$0xff] }
 0x9d8   : > { %v4360_v42 = vpop.f32.mrf.mxu0  ;;  %v3579_v60 = vmul.f32 %v5766_v12, %v5751_v10 }
 0x9d9   : > { %v3621_v28 = vadd.f32 %v4600_v2, %v3613_v11  ;;  %v3612_v44 = vadd.f32 %v3604_v38, %v3581_v58  ;;  %v3584_v33 = vadd.f32 %v3576_v50, %v3536_v29  ;;  %v3535_v0 = vadd.f32 %v3527_v36, %v2631_v6 }
 0x9da   : > { %v3530_v1 = vmul.f32 %v4360_v42, %v3515_v43  ;;  %v3474_v40 = vpop.f32.mrf.mxu0  ;;  %v3596_v38 = vsub.f32 1.0, %v5759_v5  ;;  %v1723_v50 = vmul.f32 %v5755_v14, %v5437_v49  ;;  %v3580_v49 = vmul.f32 %v5766_v12, %v5759_v5 }
 0x9db   : > { %3629 = vst.msk [vmem:[%s5809_s22 + $0x8] sm:$0xff] %vm460_vm0, %v3621_v28  ;;  %v3620_v47 = vadd.f32 %v4601_v7, %v3612_v44  ;;  %v3615_v53 = vadd.f32 %v3607_v51, %v3584_v33  ;;  %v3583_v18 = vadd.f32 %v5777_v48, %v3535_v0  ;;  %v3529_v27 = vmul.f32 %v3511_v59, %v3474_v40 }
 0x9dc   : > { %v3538_v41 = vadd.f32 %v3530_v1, %v2634_v39  ;;  %v4363_v56 = vpop.f32.mrf.mxu0  ;;  %v2635_v14 = vadd.f32 %v2627_v46, %v1723_v50 }
 0x9dd   : > { %3628 = vst.msk [vmem:[%s5809_s22] sm:$0xff] %vm460_vm0, %v3620_v47  ;;  %v3623_v30 = vadd.f32 %v4602_v8, %v3615_v53  ;;  %v3614_v51 = vadd.f32 %v5782_v23, %v3583_v18  ;;  %v3537_v52 = vadd.f32 %v3529_v27, %v2633_v26  ;;  %v3532_v48 = vmul.f32 %v4363_v56, %v3523_v45 }
 0x9de   : > { %v3586_v15 = vadd.f32 %v3578_v55, %v3538_v41  ;;  %v3484_v35 = vpop.f32.mrf.mxu0  ;;  %v3611_v55 = vmul.f32 %v5772_v20, %v3596_v38 }
 0x9df   : > { %3631 = vst.msk [vmem:[%s5809_s22 + $0x18] sm:$0xff] %vm460_vm0, %v3623_v30  ;;  %v3622_v3 = vadd.f32 %v4603_v57, %v3614_v51  ;;  %v3585_v23 = vadd.f32 %v5795_v32, %v3537_v52  ;;  %v3540_v17 = vadd.f32 %v3532_v48, %v2636_v9  ;;  %v3531_v22 = vmul.f32 %v3519_v61, %v3484_v35  ;;  %v4604_v32 = vld [vmem:[%s4737_s14 + $0x28] sm:$0xff] }
 0x9e0   : > { %v3617_v5 = vadd.f32 %v5799_v31, %v3586_v15  ;;  %v4606_v31 = vld [vmem:[%s4737_s14 + $0x38] sm:$0xff] }
 0x9e1   : > { %3630 = vst.msk [vmem:[%s5809_s22 + $0x10] sm:$0xff] %vm460_vm0, %v3622_v3  ;;  %v3616_v24 = vadd.f32 %v3608_v63, %v3585_v23  ;;  %v3588_v4 = vadd.f32 %v3580_v49, %v3540_v17  ;;  %v3539_v34 = vadd.f32 %v3531_v22, %v2635_v14  ;;  %v4607_v63 = vld [vmem:[%s4737_s14 + $0x30] sm:$0xff] }
 0x9e2   : > { %v3625_v6 = vadd.f32 %v4604_v32, %v3617_v5 }
 0x9e3   : > { %v3624_v62 = vadd.f32 %v4605_v19, %v3616_v24  ;;  %v3619_v10 = vadd.f32 %v3611_v55, %v3588_v4  ;;  %v3587_v12 = vadd.f32 %v3579_v60, %v3539_v34 }
 0x9e4   : > { %3633 = vst.msk [vmem:[%s5809_s22 + $0x28] sm:$0xff] %vm460_vm0, %v3625_v6 }
 0x9e5   : > { %3632 = vst.msk [vmem:[%s5809_s22 + $0x20] sm:$0xff] %vm460_vm0, %v3624_v62  ;;  %v3627_v43 = vadd.f32 %v4606_v31, %v3619_v10  ;;  %v3618_v11 = vadd.f32 %v3610_v21, %v3587_v12 }
 0x9e7   : > { %3635 = vst.msk [vmem:[%s5809_s22 + $0x38] sm:$0xff] %vm460_vm0, %v3627_v43  ;;  %v3626_v58 = vadd.f32 %v4607_v63, %v3618_v11 }
 0x9e9   : > { %3634 = vst.msk [vmem:[%s5809_s22 + $0x30] sm:$0xff] %vm460_vm0, %v3626_v58 }
 0x9ea PF: > { %s19_s11 = sadd.s32 1, %s4630_s11   ;;  %s5876_s30 = smov %s4626_s10 }
 0x9eb   : > { %p16_p5 = scmp.ge.s32.totalorder %s19_s11, 4   ;;  %s5877_s10 = smov %s5879_s12 }
 0x9ed   :  { %18 = sbr.rel (!%p16_p5) target bundleno = 2 (0x2), region = 92 }

</bundles_post_ra>
